<compile_context>
chip_gen: v6e
topology: v6e:2x2x1
jax: 0.10.0
libtpu: 0.0.40
codegen_flags: <defaults>
</compile_context>

<pallas_src>
import jax
import jax.numpy as jnp
from jax import lax
from jax.experimental import pallas as pl
from jax.experimental.pallas import tpu as pltpu


def _round_up(x, m):
    return ((x + m - 1) // m) * m


# ----------------------- Pallas kernel: fused MLP + ReLU + max over samples ------------------
def _make_mlp_maxpool_kernel(num_inputs, num_layers, s_tile):
    """Fused per-point MLP + ReLU + running max over the nsample axis.

    Block layout (points on lanes, channels on sublanes):
      x_t     : (s_tile, C_t, G)  bf16   (t = 0..num_inputs-1; xyz / features)
      w0_t    : (Cout0, C_t)      bf16   (first-layer weight slice for input t)
      b_l     : (Cout_l, 1)       f32
      w_l     : (Cout_l, Cout_{l-1}) bf16, l >= 1
      out_ref : (Cout_last, G)    f32    (resident across the S grid axis; holds the
                                          running max, written back after the last S step)
    """

    def kernel(*refs):
        out_ref = refs[-1]
        xs = refs[:num_inputs]
        params = refs[num_inputs:-1]

        s_blk = pl.program_id(1)

        @pl.when(s_blk == 0)
        def _init():
            # Post-ReLU values are >= 0, so a zero init is equivalent to -inf for the max.
            out_ref[...] = jnp.zeros_like(out_ref)

        g = out_ref.shape[1]

        # Hoist weight / bias loads and the lane-broadcast of the bias out of the
        # per-sample loop (once per grid step instead of S * num_layers times).
        w0s = [params[t][...] for t in range(num_inputs)]
        b0 = params[num_inputs][...]
        biases = [jnp.broadcast_to(b0, (b0.shape[0], g))]
        w_rest = []
        p = num_inputs + 1
        for _ in range(1, num_layers):
            w = params[p][...]
            b = params[p + 1][...]
            w_rest.append(w)
            biases.append(jnp.broadcast_to(b, (b.shape[0], g)))
            p += 2

        def per_sample(s, acc):
            h = biases[0]                                              # f32 (Cout0, G)
            for t in range(num_inputs):
                h = h + jnp.dot(w0s[t], xs[t][s],
                                preferred_element_type=jnp.float32)    # bf16 x bf16 -> f32
            h = jnp.maximum(h, 0.0)
            for l in range(1, num_layers):
                h = jnp.dot(w_rest[l - 1], h.astype(jnp.bfloat16),
                            preferred_element_type=jnp.float32) + biases[l]
                h = jnp.maximum(h, 0.0)
            return jnp.maximum(acc, h)                                 # running max == max_pool2d

        acc = out_ref[...]
        if s_tile <= 8:
            for s in range(s_tile):                                    # small static unroll
                acc = per_sample(s, acc)
        else:
            # bounded unroll: inner static chunk of <= 8, outer fori_loop
            u = max(d for d in (8, 4, 2, 1) if s_tile % d == 0)

            def chunk(c, a):
                for j in range(u):
                    a = per_sample(c * u + j, a)
                return a

            acc = lax.fori_loop(0, s_tile // u, chunk, acc)
        out_ref[...] = acc

    return kernel


def _choose_tiles(m, s, c_pad, cout_pad, w_bytes):
    """Generation-aware tile choice.

    Returns (g, m_pad, s_tile, vmem_limit_bytes):
      g       lane tile over B*P points (multiple of 128, or == m for tiny problems)
      m_pad   padded point count (multiple of g)
      s_tile  nsample tile (a divisor of s)
    """
    try:
        cap = int(getattr(pltpu.get_tpu_info(), "vmem_capacity_bytes", 64 * 1024 * 1024))
    except Exception:
        cap = 64 * 1024 * 1024
    if cap >= 100 * 1024 * 1024:          # v5e / v6e: 128 MiB physical VMEM
        total_cap, vmem_limit, g_pref = 80 << 20, 96 << 20, 1024
    else:                                 # v7x: 64 MiB per TensorCore
        total_cap, vmem_limit, g_pref = 36 << 20, 48 << 20, 512

    def est(s_tile, g):
        in_b = s_tile * c_pad * g * 2          # bf16 inputs (double-buffered below)
        out_b = cout_pad * g * 4               # f32 output block (also the accumulator)
        return 2 * in_b + 2 * out_b + w_bytes + (2 << 20)   # + slack for compiler scratch

    if m <= 128:
        g = m                                   # full-dim lane block, no padding
    else:
        m128 = _round_up(m, 128)
        g_steps = _round_up((m128 + 3) // 4, 128)        # ~4 grid steps along points
        g = min(g_pref, max(512, g_steps), m128)

    divisors = [d for d in range(s, 0, -1) if s % d == 0]
    s_tile = None
    while s_tile is None:
        for d in divisors:
            if est(d, g) <= total_cap:
                s_tile = d
                break
        if s_tile is None:
            if g <= 128:
                s_tile = 1
            else:
                g = max(128, _round_up(g // 2, 128))
    m_pad = _round_up(m, g)
    return g, m_pad, s_tile, vmem_limit


def _sa_scale(xyz, features, center, idx, ws, bs, use_xyz):
    """One MSG scale: gather -> fused MLP+ReLU+max kernel.

    xyz (B,N,3) f32, features (B,C,N) f32 or None, center (B,P,3) or None (GroupAll),
    idx (B,P,S) int32 ball-query indices.  Returns (B, Cout_last, P) f32.
    """
    assert use_xyz or features is not None
    B, N, _ = xyz.shape
    P, S = idx.shape[1], idx.shape[2]
    m = B * P
    cout = ws[-1].shape[0]
    c_xyz = 3 if use_xyz else 0
    c_feat = features.shape[1] if features is not None else 0

    c_pad = (_round_up(c_xyz, 8) if c_xyz else 0) + (_round_up(c_feat, 8) if c_feat else 0)
    w_bytes = sum(int(w.size) * 2 for w in ws) + sum(int(b.size) * 4 for b in bs)
    g, m_pad, s_tile, vmem_limit = _choose_tiles(m, S, c_pad, _round_up(cout, 8), w_bytes)

    # Flattened gather indices in the kernel's (S, B*P) layout, padded on lanes.
    flat_idx = idx + (jnp.arange(B, dtype=jnp.int32) * N)[:, None, None]     # (B,P,S)
    flat_idx = jnp.transpose(flat_idx, (2, 0, 1)).reshape(S, m)              # (S, M)
    if m_pad > m:
        flat_idx = jnp.pad(flat_idx, ((0, 0), (0, m_pad - m)))               # idx 0: finite, sliced off

    xs, w0_parts = [], []
    w0 = ws[0].astype(jnp.float32)
    if use_xyz:
        xyz_t = jnp.transpose(xyz, (2, 0, 1)).reshape(3, B * N)              # tiny (3, B*N) copy
        gx = jax.vmap(lambda i: xyz_t[:, i])(flat_idx)                       # one gather -> (S,3,M_pad) f32
        if center is not None:
            c_t = jnp.transpose(center, (2, 0, 1)).reshape(3, m)
            if m_pad > m:
                c_t = jnp.pad(c_t, ((0, 0), (0, m_pad - m)))
            gx = gx - c_t[None]                                              # relative coords in f32
        xs.append(gx.astype(jnp.bfloat16))
        w0_parts.append(w0[:, :3].astype(jnp.bfloat16))
    if features is not None:
        feat_t = jnp.transpose(features.astype(jnp.bfloat16), (1, 0, 2)).reshape(c_feat, B * N)
        gf = jax.vmap(lambda i: feat_t[:, i])(flat_idx)                      # one gather -> (S,C,M_pad) bf16
        xs.append(gf)
        w0_parts.append(w0[:, c_xyz:].astype(jnp.bfloat16))

    params = list(w0_parts) + [bs[0].reshape(-1, 1).astype(jnp.float32)]
    for w, b in zip(ws[1:], bs[1:]):
        params += [w.astype(jnp.bfloat16), b.reshape(-1, 1).astype(jnp.float32)]

    in_specs = [pl.BlockSpec((s_tile, x.shape[1], g), lambda i, s: (s, 0, i)) for x in xs]
    in_specs += [pl.BlockSpec(p.shape, lambda i, s: (0, 0)) for p in params]

    out = pl.pallas_call(
        _make_mlp_maxpool_kernel(len(xs), len(ws), s_tile),
        out_shape=jax.ShapeDtypeStruct((cout, m_pad), jnp.float32),
        grid_spec=pltpu.PrefetchScalarGridSpec(
            num_scalar_prefetch=0,
            grid=(m_pad // g, S // s_tile),          # reduction (nsample) axis last
            in_specs=in_specs,
            out_specs=pl.BlockSpec((cout, g), lambda i, s: (0, i)),
        ),
        compiler_params=pltpu.CompilerParams(
            dimension_semantics=("parallel", "arbitrary"),
            vmem_limit_bytes=vmem_limit,
        ),
    )(*xs, *params)

    # (Cout, M) -> (B, Cout, P); cheap transpose of a small, lane-dense result.
    return jnp.transpose(out[:, :m].reshape(cout, B, P), (1, 0, 2))


# ----------------------------- plain-JAX glue (sampling / grouping) --------------------------
def furthest_point_sample(xyz, npoint):
    # Original call is furthest_point_sample(xyz, npoint, 1.0, 0.0); with weights (1.0, 0.0)
    # it reduces to standard xyz-distance FPS.
    B, N, _ = xyz.shape

    def single(pts):
        def body(i, state):
            dist, idxs, last = state
            d = jnp.sum((pts - pts[last]) ** 2, axis=-1)
            dist = jnp.minimum(dist, d)
            nxt = jnp.argmax(dist).astype(jnp.int32)
            idxs = idxs.at[i].set(nxt)
            return dist, idxs, nxt

        dist0 = jnp.full((N,), 1e10, jnp.float32)
        idxs0 = jnp.zeros((npoint,), jnp.int32)
        _, idxs, _ = lax.fori_loop(1, npoint, body, (dist0, idxs0, jnp.int32(0)))
        return idxs

    return jax.vmap(single)(xyz)


def ball_query(radius, nsample, xyz, new_xyz):
    """xyz (B,N,3), new_xyz (B,P,3) -> idx (B,P,nsample), CUDA ball_query semantics.

    Single-pass: one scatter over the mask instead of nsample mask/argmax sweeps.
    TODO(synk): a Pallas kernel tiling over P (d2 tile kept in VMEM) would avoid
    materializing the full (B,P,N) distance matrix."""
    B, N, _ = xyz.shape
    P = new_xyz.shape[1]
    d2 = jnp.sum((new_xyz[:, :, None, :] - xyz[:, None, :, :]) ** 2, axis=-1)   # (B,P,N)
    mask = d2 < radius ** 2
    cnt = jnp.cumsum(mask.astype(jnp.int32), axis=-1) - 1          # slot for each in-ball point
    slot = jnp.where(mask & (cnt < nsample), cnt, nsample)         # overflow / misses -> dump slot
    n_idx = jnp.broadcast_to(jnp.arange(N, dtype=jnp.int32), (B, P, N))
    b_idx = jnp.arange(B, dtype=jnp.int32)[:, None, None]
    p_idx = jnp.arange(P, dtype=jnp.int32)[None, :, None]
    filled = jnp.full((B, P, nsample + 1), -1, jnp.int32)
    filled = filled.at[b_idx, p_idx, slot].set(n_idx)[..., :nsample]
    first = jnp.argmax(mask, axis=-1).astype(jnp.int32)            # 0 when the ball is empty
    return jnp.where(filled >= 0, filled, first[..., None])


# -------------------------------------- the module -------------------------------------------
class PointNetSAModuleMSG:
    def __init__(self, key, npoint, radii, nsamples, in_channel, mlps, use_xyz=True):
        assert len(radii) == len(nsamples) == len(mlps)
        mlps = [[in_channel] + list(m) for m in mlps]
        self.npoint = npoint
        self.radii = list(radii)
        self.nsamples = list(nsamples)
        self.use_xyz = use_xyz
        self.params = []
        for mlp in mlps:
            mlp = list(mlp)
            if use_xyz:
                mlp[0] += 3
            ws, bs = [], []
            for cin, cout in zip(mlp[:-1], mlp[1:]):
                key, k1, k2 = jax.random.split(key, 3)
                ws.append(0.1 * jax.random.normal(k1, (cout, cin), jnp.float32))   # PyTorch (Cout,Cin)
                bs.append(0.01 * jax.random.normal(k2, (cout,), jnp.float32))
            self.params.append((ws, bs))

    def __call__(self, xyz, features=None, new_xyz=None):
        B, N, _ = xyz.shape
        if new_xyz is None and self.npoint is not None:
            idx_fps = furthest_point_sample(xyz, self.npoint)
            new_xyz = jax.vmap(lambda p, i: p[i])(xyz, idx_fps)        # (B, npoint, 3)

        outs = []
        for r, ns, (ws, bs) in zip(self.radii, self.nsamples, self.params):
            if self.npoint is not None:
                idx = ball_query(r, ns, xyz, new_xyz)                  # (B,P,S)
                center = new_xyz
            else:
                # GroupAll: a single group containing all N points, no centering
                idx = jnp.broadcast_to(jnp.arange(N, dtype=jnp.int32), (B, 1, N))
                center = None
            outs.append(_sa_scale(xyz, features, center, idx, ws, bs, self.use_xyz))

        return new_xyz, jnp.concatenate(outs, axis=1)


if __name__ == "__main__":
    key = jax.random.PRNGKey(0)
    kx, kf, kp = jax.random.split(key, 3)
    B, N, C = 2, 64, 4
    npoint = 16
    xyz = jax.random.uniform(kx, (B, N, 3), jnp.float32)
    features = jax.random.normal(kf, (B, C, N), jnp.float32)

    module = PointNetSAModuleMSG(
        kp, npoint=npoint, radii=[0.2, 0.4], nsamples=[8, 16],
        in_channel=C, mlps=[[8, 16], [8, 32]], use_xyz=True)

    fwd = jax.jit(module.__call__)
    new_xyz, new_features = fwd(xyz, features)
    jax.block_until_ready((new_xyz, new_features))
    assert new_xyz.shape == (B, npoint, 3)
    assert new_features.shape == (B, 16 + 32, npoint)
    assert bool(jnp.all(jnp.isfinite(new_features)))
    print("KERNEL_OK")
</pallas_src>

<mosaic_0001>
module attributes {stable_mosaic.version = 11 : i64} {
  func.func @kernel(%arg0: i32, %arg1: i32, %arg2: memref<8x3x32xbf16, #tpu.memory_space<vmem>>, %arg3: memref<8x4x32xbf16, #tpu.memory_space<vmem>>, %arg4: memref<8x3xbf16, #tpu.memory_space<vmem>>, %arg5: memref<8x4xbf16, #tpu.memory_space<vmem>>, %arg6: memref<8x1xf32, #tpu.memory_space<vmem>>, %arg7: memref<16x8xbf16, #tpu.memory_space<vmem>>, %arg8: memref<16x1xf32, #tpu.memory_space<vmem>>, %arg9: memref<16x32xf32, #tpu.memory_space<vmem>>) attributes {dimension_semantics = [#tpu.dimension_semantics<parallel>, #tpu.dimension_semantics<arbitrary>], iteration_bounds = array<i64: 1, 1>, scalar_prefetch = 0 : i64, scratch_operands = 0 : i64, tpu.core_type = #tpu.core_type<tc>, window_params = [{transform_indices = @transform_0, window_bounds = array<i64: 8, 3, 32>}, {transform_indices = @transform_1, window_bounds = array<i64: 8, 4, 32>}, {pipeline_mode = #tpu.pipeline_mode<synchronous>, transform_indices = @transform_2, window_bounds = array<i64: 8, 3>}, {pipeline_mode = #tpu.pipeline_mode<synchronous>, transform_indices = @transform_3, window_bounds = array<i64: 8, 4>}, {pipeline_mode = #tpu.pipeline_mode<synchronous>, transform_indices = @transform_4, window_bounds = array<i64: 8, 1>}, {pipeline_mode = #tpu.pipeline_mode<synchronous>, transform_indices = @transform_5, window_bounds = array<i64: 16, 8>}, {pipeline_mode = #tpu.pipeline_mode<synchronous>, transform_indices = @transform_6, window_bounds = array<i64: 16, 1>}, {transform_indices = @transform_7, window_bounds = array<i64: 16, 32>}]} {
    %c0_i32 = arith.constant 0 : i32
    %0 = arith.cmpi eq, %arg1, %c0_i32 : i32
    %1 = arith.extui %0 : i1 to i32
    %c0_i32_0 = arith.constant 0 : i32
    %2 = arith.cmpi ne, %1, %c0_i32_0 : i32
    scf.if %2 {
      %cst_94 = arith.constant 0.000000e+00 : f32
      %142 = vector.broadcast %cst_94 : f32 to vector<16x32xf32>
      %c0_95 = arith.constant 0 : index
      %c0_96 = arith.constant 0 : index
      %143 = vector.load %arg9[%c0_95, %c0_96] : memref<16x32xf32, #tpu.memory_space<vmem>>, vector<16x32xf32>
      tpu.vector_store %arg9[%c0_95, %c0_96], %142 {strides = array<i32>} : memref<16x32xf32, #tpu.memory_space<vmem>>, vector<16x32xf32>,
    } else {
    }
    %c0 = arith.constant 0 : index
    %c0_1 = arith.constant 0 : index
    %3 = vector.load %arg4[%c0, %c0_1] : memref<8x3xbf16, #tpu.memory_space<vmem>>, vector<8x3xbf16>
    %c0_2 = arith.constant 0 : index
    %c0_3 = arith.constant 0 : index
    %4 = vector.load %arg5[%c0_2, %c0_3] : memref<8x4xbf16, #tpu.memory_space<vmem>>, vector<8x4xbf16>
    %c0_4 = arith.constant 0 : index
    %c0_5 = arith.constant 0 : index
    %5 = vector.load %arg6[%c0_4, %c0_5] : memref<8x1xf32, #tpu.memory_space<vmem>>, vector<8x1xf32>
    %6 = vector.shape_cast %5 : vector<8x1xf32> to vector<8x1xf32>
    %7 = vector.broadcast %6 : vector<8x1xf32> to vector<8x32xf32>
    %c0_6 = arith.constant 0 : index
    %c0_7 = arith.constant 0 : index
    %8 = vector.load %arg7[%c0_6, %c0_7] : memref<16x8xbf16, #tpu.memory_space<vmem>>, vector<16x8xbf16>
    %c0_8 = arith.constant 0 : index
    %c0_9 = arith.constant 0 : index
    %9 = vector.load %arg8[%c0_8, %c0_9] : memref<16x1xf32, #tpu.memory_space<vmem>>, vector<16x1xf32>
    %10 = vector.shape_cast %9 : vector<16x1xf32> to vector<16x1xf32>
    %11 = vector.broadcast %10 : vector<16x1xf32> to vector<16x32xf32>
    %c0_10 = arith.constant 0 : index
    %c0_11 = arith.constant 0 : index
    %12 = vector.load %arg9[%c0_10, %c0_11] : memref<16x32xf32, #tpu.memory_space<vmem>>, vector<16x32xf32>
    %c0_12 = arith.constant 0 : index
    %c0_13 = arith.constant 0 : index
    %c0_14 = arith.constant 0 : index
    %13 = vector.load %arg2[%c0_12, %c0_13, %c0_14] : memref<8x3x32xbf16, #tpu.memory_space<vmem>>, vector<1x3x32xbf16>
    %14 = vector.shape_cast %13 : vector<1x3x32xbf16> to vector<3x32xbf16>
    %cst = arith.constant dense<0.000000e+00> : vector<8x32xf32>
    %15 = tpu.matmul %3, %14, %cst {dimension_numbers = #tpu.dot_dimension_numbers<[1], [0], [0], [1], [0, 0, 1, 1], [], []>} : vector<8x3xbf16>, vector<3x32xbf16>, vector<8x32xf32> -> vector<8x32xf32>
    %16 = arith.addf %7, %15 : vector<8x32xf32>
    %c0_15 = arith.constant 0 : index
    %c0_16 = arith.constant 0 : index
    %c0_17 = arith.constant 0 : index
    %17 = vector.load %arg3[%c0_15, %c0_16, %c0_17] : memref<8x4x32xbf16, #tpu.memory_space<vmem>>, vector<1x4x32xbf16>
    %18 = vector.shape_cast %17 : vector<1x4x32xbf16> to vector<4x32xbf16>
    %cst_18 = arith.constant dense<0.000000e+00> : vector<8x32xf32>
    %19 = tpu.matmul %4, %18, %cst_18 {dimension_numbers = #tpu.dot_dimension_numbers<[1], [0], [0], [1], [0, 0, 1, 1], [], []>} : vector<8x4xbf16>, vector<4x32xbf16>, vector<8x32xf32> -> vector<8x32xf32>
    %20 = arith.addf %16, %19 : vector<8x32xf32>
    %cst_19 = arith.constant 0.000000e+00 : f32
    %21 = vector.broadcast %cst_19 : f32 to vector<8x32xf32>
    %22 = arith.maximumf %20, %21 : vector<8x32xf32>
    %23 = arith.truncf %22 : vector<8x32xf32> to vector<8x32xbf16>
    %cst_20 = arith.constant dense<0.000000e+00> : vector<16x32xf32>
    %24 = tpu.matmul %8, %23, %cst_20 {dimension_numbers = #tpu.dot_dimension_numbers<[1], [0], [0], [1], [0, 0, 1, 1], [], []>} : vector<16x8xbf16>, vector<8x32xbf16>, vector<16x32xf32> -> vector<16x32xf32>
    %25 = arith.addf %24, %11 : vector<16x32xf32>
    %cst_21 = arith.constant 0.000000e+00 : f32
    %26 = vector.broadcast %cst_21 : f32 to vector<16x32xf32>
    %27 = arith.maximumf %25, %26 : vector<16x32xf32>
    %28 = arith.maximumf %12, %27 : vector<16x32xf32>
    %c1 = arith.constant 1 : index
    %c0_22 = arith.constant 0 : index
    %c0_23 = arith.constant 0 : index
    %29 = vector.load %arg2[%c1, %c0_22, %c0_23] : memref<8x3x32xbf16, #tpu.memory_space<vmem>>, vector<1x3x32xbf16>
    %30 = vector.shape_cast %29 : vector<1x3x32xbf16> to vector<3x32xbf16>
    %cst_24 = arith.constant dense<0.000000e+00> : vector<8x32xf32>
    %31 = tpu.matmul %3, %30, %cst_24 {dimension_numbers = #tpu.dot_dimension_numbers<[1], [0], [0], [1], [0, 0, 1, 1], [], []>} : vector<8x3xbf16>, vector<3x32xbf16>, vector<8x32xf32> -> vector<8x32xf32>
    %32 = arith.addf %7, %31 : vector<8x32xf32>
    %c1_25 = arith.constant 1 : index
    %c0_26 = arith.constant 0 : index
    %c0_27 = arith.constant 0 : index
    %33 = vector.load %arg3[%c1_25, %c0_26, %c0_27] : memref<8x4x32xbf16, #tpu.memory_space<vmem>>, vector<1x4x32xbf16>
    %34 = vector.shape_cast %33 : vector<1x4x32xbf16> to vector<4x32xbf16>
    %cst_28 = arith.constant dense<0.000000e+00> : vector<8x32xf32>
    %35 = tpu.matmul %4, %34, %cst_28 {dimension_numbers = #tpu.dot_dimension_numbers<[1], [0], [0], [1], [0, 0, 1, 1], [], []>} : vector<8x4xbf16>, vector<4x32xbf16>, vector<8x32xf32> -> vector<8x32xf32>
    %36 = arith.addf %32, %35 : vector<8x32xf32>
    %cst_29 = arith.constant 0.000000e+00 : f32
    %37 = vector.broadcast %cst_29 : f32 to vector<8x32xf32>
    %38 = arith.maximumf %36, %37 : vector<8x32xf32>
    %39 = arith.truncf %38 : vector<8x32xf32> to vector<8x32xbf16>
    %cst_30 = arith.constant dense<0.000000e+00> : vector<16x32xf32>
    %40 = tpu.matmul %8, %39, %cst_30 {dimension_numbers = #tpu.dot_dimension_numbers<[1], [0], [0], [1], [0, 0, 1, 1], [], []>} : vector<16x8xbf16>, vector<8x32xbf16>, vector<16x32xf32> -> vector<16x32xf32>
    %41 = arith.addf %40, %11 : vector<16x32xf32>
    %cst_31 = arith.constant 0.000000e+00 : f32
    %42 = vector.broadcast %cst_31 : f32 to vector<16x32xf32>
    %43 = arith.maximumf %41, %42 : vector<16x32xf32>
    %44 = arith.maximumf %28, %43 : vector<16x32xf32>
    %c2 = arith.constant 2 : index
    %c0_32 = arith.constant 0 : index
    %c0_33 = arith.constant 0 : index
    %45 = vector.load %arg2[%c2, %c0_32, %c0_33] : memref<8x3x32xbf16, #tpu.memory_space<vmem>>, vector<1x3x32xbf16>
    %46 = vector.shape_cast %45 : vector<1x3x32xbf16> to vector<3x32xbf16>
    %cst_34 = arith.constant dense<0.000000e+00> : vector<8x32xf32>
    %47 = tpu.matmul %3, %46, %cst_34 {dimension_numbers = #tpu.dot_dimension_numbers<[1], [0], [0], [1], [0, 0, 1, 1], [], []>} : vector<8x3xbf16>, vector<3x32xbf16>, vector<8x32xf32> -> vector<8x32xf32>
    %48 = arith.addf %7, %47 : vector<8x32xf32>
    %c2_35 = arith.constant 2 : index
    %c0_36 = arith.constant 0 : index
    %c0_37 = arith.constant 0 : index
    %49 = vector.load %arg3[%c2_35, %c0_36, %c0_37] : memref<8x4x32xbf16, #tpu.memory_space<vmem>>, vector<1x4x32xbf16>
    %50 = vector.shape_cast %49 : vector<1x4x32xbf16> to vector<4x32xbf16>
    %cst_38 = arith.constant dense<0.000000e+00> : vector<8x32xf32>
    %51 = tpu.matmul %4, %50, %cst_38 {dimension_numbers = #tpu.dot_dimension_numbers<[1], [0], [0], [1], [0, 0, 1, 1], [], []>} : vector<8x4xbf16>, vector<4x32xbf16>, vector<8x32xf32> -> vector<8x32xf32>
    %52 = arith.addf %48, %51 : vector<8x32xf32>
    %cst_39 = arith.constant 0.000000e+00 : f32
    %53 = vector.broadcast %cst_39 : f32 to vector<8x32xf32>
    %54 = arith.maximumf %52, %53 : vector<8x32xf32>
    %55 = arith.truncf %54 : vector<8x32xf32> to vector<8x32xbf16>
    %cst_40 = arith.constant dense<0.000000e+00> : vector<16x32xf32>
    %56 = tpu.matmul %8, %55, %cst_40 {dimension_numbers = #tpu.dot_dimension_numbers<[1], [0], [0], [1], [0, 0, 1, 1], [], []>} : vector<16x8xbf16>, vector<8x32xbf16>, vector<16x32xf32> -> vector<16x32xf32>
    %57 = arith.addf %56, %11 : vector<16x32xf32>
    %cst_41 = arith.constant 0.000000e+00 : f32
    %58 = vector.broadcast %cst_41 : f32 to vector<16x32xf32>
    %59 = arith.maximumf %57, %58 : vector<16x32xf32>
    %60 = arith.maximumf %44, %59 : vector<16x32xf32>
    %c3 = arith.constant 3 : index
    %c0_42 = arith.constant 0 : index
    %c0_43 = arith.constant 0 : index
    %61 = vector.load %arg2[%c3, %c0_42, %c0_43] : memref<8x3x32xbf16, #tpu.memory_space<vmem>>, vector<1x3x32xbf16>
    %62 = vector.shape_cast %61 : vector<1x3x32xbf16> to vector<3x32xbf16>
    %cst_44 = arith.constant dense<0.000000e+00> : vector<8x32xf32>
    %63 = tpu.matmul %3, %62, %cst_44 {dimension_numbers = #tpu.dot_dimension_numbers<[1], [0], [0], [1], [0, 0, 1, 1], [], []>} : vector<8x3xbf16>, vector<3x32xbf16>, vector<8x32xf32> -> vector<8x32xf32>
    %64 = arith.addf %7, %63 : vector<8x32xf32>
    %c3_45 = arith.constant 3 : index
    %c0_46 = arith.constant 0 : index
    %c0_47 = arith.constant 0 : index
    %65 = vector.load %arg3[%c3_45, %c0_46, %c0_47] : memref<8x4x32xbf16, #tpu.memory_space<vmem>>, vector<1x4x32xbf16>
    %66 = vector.shape_cast %65 : vector<1x4x32xbf16> to vector<4x32xbf16>
    %cst_48 = arith.constant dense<0.000000e+00> : vector<8x32xf32>
    %67 = tpu.matmul %4, %66, %cst_48 {dimension_numbers = #tpu.dot_dimension_numbers<[1], [0], [0], [1], [0, 0, 1, 1], [], []>} : vector<8x4xbf16>, vector<4x32xbf16>, vector<8x32xf32> -> vector<8x32xf32>
    %68 = arith.addf %64, %67 : vector<8x32xf32>
    %cst_49 = arith.constant 0.000000e+00 : f32
    %69 = vector.broadcast %cst_49 : f32 to vector<8x32xf32>
    %70 = arith.maximumf %68, %69 : vector<8x32xf32>
    %71 = arith.truncf %70 : vector<8x32xf32> to vector<8x32xbf16>
    %cst_50 = arith.constant dense<0.000000e+00> : vector<16x32xf32>
    %72 = tpu.matmul %8, %71, %cst_50 {dimension_numbers = #tpu.dot_dimension_numbers<[1], [0], [0], [1], [0, 0, 1, 1], [], []>} : vector<16x8xbf16>, vector<8x32xbf16>, vector<16x32xf32> -> vector<16x32xf32>
    %73 = arith.addf %72, %11 : vector<16x32xf32>
    %cst_51 = arith.constant 0.000000e+00 : f32
    %74 = vector.broadcast %cst_51 : f32 to vector<16x32xf32>
    %75 = arith.maximumf %73, %74 : vector<16x32xf32>
    %76 = arith.maximumf %60, %75 : vector<16x32xf32>
    %c4 = arith.constant 4 : index
    %c0_52 = arith.constant 0 : index
    %c0_53 = arith.constant 0 : index
    %77 = vector.load %arg2[%c4, %c0_52, %c0_53] : memref<8x3x32xbf16, #tpu.memory_space<vmem>>, vector<1x3x32xbf16>
    %78 = vector.shape_cast %77 : vector<1x3x32xbf16> to vector<3x32xbf16>
    %cst_54 = arith.constant dense<0.000000e+00> : vector<8x32xf32>
    %79 = tpu.matmul %3, %78, %cst_54 {dimension_numbers = #tpu.dot_dimension_numbers<[1], [0], [0], [1], [0, 0, 1, 1], [], []>} : vector<8x3xbf16>, vector<3x32xbf16>, vector<8x32xf32> -> vector<8x32xf32>
    %80 = arith.addf %7, %79 : vector<8x32xf32>
    %c4_55 = arith.constant 4 : index
    %c0_56 = arith.constant 0 : index
    %c0_57 = arith.constant 0 : index
    %81 = vector.load %arg3[%c4_55, %c0_56, %c0_57] : memref<8x4x32xbf16, #tpu.memory_space<vmem>>, vector<1x4x32xbf16>
    %82 = vector.shape_cast %81 : vector<1x4x32xbf16> to vector<4x32xbf16>
    %cst_58 = arith.constant dense<0.000000e+00> : vector<8x32xf32>
    %83 = tpu.matmul %4, %82, %cst_58 {dimension_numbers = #tpu.dot_dimension_numbers<[1], [0], [0], [1], [0, 0, 1, 1], [], []>} : vector<8x4xbf16>, vector<4x32xbf16>, vector<8x32xf32> -> vector<8x32xf32>
    %84 = arith.addf %80, %83 : vector<8x32xf32>
    %cst_59 = arith.constant 0.000000e+00 : f32
    %85 = vector.broadcast %cst_59 : f32 to vector<8x32xf32>
    %86 = arith.maximumf %84, %85 : vector<8x32xf32>
    %87 = arith.truncf %86 : vector<8x32xf32> to vector<8x32xbf16>
    %cst_60 = arith.constant dense<0.000000e+00> : vector<16x32xf32>
    %88 = tpu.matmul %8, %87, %cst_60 {dimension_numbers = #tpu.dot_dimension_numbers<[1], [0], [0], [1], [0, 0, 1, 1], [], []>} : vector<16x8xbf16>, vector<8x32xbf16>, vector<16x32xf32> -> vector<16x32xf32>
    %89 = arith.addf %88, %11 : vector<16x32xf32>
    %cst_61 = arith.constant 0.000000e+00 : f32
    %90 = vector.broadcast %cst_61 : f32 to vector<16x32xf32>
    %91 = arith.maximumf %89, %90 : vector<16x32xf32>
    %92 = arith.maximumf %76, %91 : vector<16x32xf32>
    %c5 = arith.constant 5 : index
    %c0_62 = arith.constant 0 : index
    %c0_63 = arith.constant 0 : index
    %93 = vector.load %arg2[%c5, %c0_62, %c0_63] : memref<8x3x32xbf16, #tpu.memory_space<vmem>>, vector<1x3x32xbf16>
    %94 = vector.shape_cast %93 : vector<1x3x32xbf16> to vector<3x32xbf16>
    %cst_64 = arith.constant dense<0.000000e+00> : vector<8x32xf32>
    %95 = tpu.matmul %3, %94, %cst_64 {dimension_numbers = #tpu.dot_dimension_numbers<[1], [0], [0], [1], [0, 0, 1, 1], [], []>} : vector<8x3xbf16>, vector<3x32xbf16>, vector<8x32xf32> -> vector<8x32xf32>
    %96 = arith.addf %7, %95 : vector<8x32xf32>
    %c5_65 = arith.constant 5 : index
    %c0_66 = arith.constant 0 : index
    %c0_67 = arith.constant 0 : index
    %97 = vector.load %arg3[%c5_65, %c0_66, %c0_67] : memref<8x4x32xbf16, #tpu.memory_space<vmem>>, vector<1x4x32xbf16>
    %98 = vector.shape_cast %97 : vector<1x4x32xbf16> to vector<4x32xbf16>
    %cst_68 = arith.constant dense<0.000000e+00> : vector<8x32xf32>
    %99 = tpu.matmul %4, %98, %cst_68 {dimension_numbers = #tpu.dot_dimension_numbers<[1], [0], [0], [1], [0, 0, 1, 1], [], []>} : vector<8x4xbf16>, vector<4x32xbf16>, vector<8x32xf32> -> vector<8x32xf32>
    %100 = arith.addf %96, %99 : vector<8x32xf32>
    %cst_69 = arith.constant 0.000000e+00 : f32
    %101 = vector.broadcast %cst_69 : f32 to vector<8x32xf32>
    %102 = arith.maximumf %100, %101 : vector<8x32xf32>
    %103 = arith.truncf %102 : vector<8x32xf32> to vector<8x32xbf16>
    %cst_70 = arith.constant dense<0.000000e+00> : vector<16x32xf32>
    %104 = tpu.matmul %8, %103, %cst_70 {dimension_numbers = #tpu.dot_dimension_numbers<[1], [0], [0], [1], [0, 0, 1, 1], [], []>} : vector<16x8xbf16>, vector<8x32xbf16>, vector<16x32xf32> -> vector<16x32xf32>
    %105 = arith.addf %104, %11 : vector<16x32xf32>
    %cst_71 = arith.constant 0.000000e+00 : f32
    %106 = vector.broadcast %cst_71 : f32 to vector<16x32xf32>
    %107 = arith.maximumf %105, %106 : vector<16x32xf32>
    %108 = arith.maximumf %92, %107 : vector<16x32xf32>
    %c6 = arith.constant 6 : index
    %c0_72 = arith.constant 0 : index
    %c0_73 = arith.constant 0 : index
    %109 = vector.load %arg2[%c6, %c0_72, %c0_73] : memref<8x3x32xbf16, #tpu.memory_space<vmem>>, vector<1x3x32xbf16>
    %110 = vector.shape_cast %109 : vector<1x3x32xbf16> to vector<3x32xbf16>
    %cst_74 = arith.constant dense<0.000000e+00> : vector<8x32xf32>
    %111 = tpu.matmul %3, %110, %cst_74 {dimension_numbers = #tpu.dot_dimension_numbers<[1], [0], [0], [1], [0, 0, 1, 1], [], []>} : vector<8x3xbf16>, vector<3x32xbf16>, vector<8x32xf32> -> vector<8x32xf32>
    %112 = arith.addf %7, %111 : vector<8x32xf32>
    %c6_75 = arith.constant 6 : index
    %c0_76 = arith.constant 0 : index
    %c0_77 = arith.constant 0 : index
    %113 = vector.load %arg3[%c6_75, %c0_76, %c0_77] : memref<8x4x32xbf16, #tpu.memory_space<vmem>>, vector<1x4x32xbf16>
    %114 = vector.shape_cast %113 : vector<1x4x32xbf16> to vector<4x32xbf16>
    %cst_78 = arith.constant dense<0.000000e+00> : vector<8x32xf32>
    %115 = tpu.matmul %4, %114, %cst_78 {dimension_numbers = #tpu.dot_dimension_numbers<[1], [0], [0], [1], [0, 0, 1, 1], [], []>} : vector<8x4xbf16>, vector<4x32xbf16>, vector<8x32xf32> -> vector<8x32xf32>
    %116 = arith.addf %112, %115 : vector<8x32xf32>
    %cst_79 = arith.constant 0.000000e+00 : f32
    %117 = vector.broadcast %cst_79 : f32 to vector<8x32xf32>
    %118 = arith.maximumf %116, %117 : vector<8x32xf32>
    %119 = arith.truncf %118 : vector<8x32xf32> to vector<8x32xbf16>
    %cst_80 = arith.constant dense<0.000000e+00> : vector<16x32xf32>
    %120 = tpu.matmul %8, %119, %cst_80 {dimension_numbers = #tpu.dot_dimension_numbers<[1], [0], [0], [1], [0, 0, 1, 1], [], []>} : vector<16x8xbf16>, vector<8x32xbf16>, vector<16x32xf32> -> vector<16x32xf32>
    %121 = arith.addf %120, %11 : vector<16x32xf32>
    %cst_81 = arith.constant 0.000000e+00 : f32
    %122 = vector.broadcast %cst_81 : f32 to vector<16x32xf32>
    %123 = arith.maximumf %121, %122 : vector<16x32xf32>
    %124 = arith.maximumf %108, %123 : vector<16x32xf32>
    %c7 = arith.constant 7 : index
    %c0_82 = arith.constant 0 : index
    %c0_83 = arith.constant 0 : index
    %125 = vector.load %arg2[%c7, %c0_82, %c0_83] : memref<8x3x32xbf16, #tpu.memory_space<vmem>>, vector<1x3x32xbf16>
    %126 = vector.shape_cast %125 : vector<1x3x32xbf16> to vector<3x32xbf16>
    %cst_84 = arith.constant dense<0.000000e+00> : vector<8x32xf32>
    %127 = tpu.matmul %3, %126, %cst_84 {dimension_numbers = #tpu.dot_dimension_numbers<[1], [0], [0], [1], [0, 0, 1, 1], [], []>} : vector<8x3xbf16>, vector<3x32xbf16>, vector<8x32xf32> -> vector<8x32xf32>
    %128 = arith.addf %7, %127 : vector<8x32xf32>
    %c7_85 = arith.constant 7 : index
    %c0_86 = arith.constant 0 : index
    %c0_87 = arith.constant 0 : index
    %129 = vector.load %arg3[%c7_85, %c0_86, %c0_87] : memref<8x4x32xbf16, #tpu.memory_space<vmem>>, vector<1x4x32xbf16>
    %130 = vector.shape_cast %129 : vector<1x4x32xbf16> to vector<4x32xbf16>
    %cst_88 = arith.constant dense<0.000000e+00> : vector<8x32xf32>
    %131 = tpu.matmul %4, %130, %cst_88 {dimension_numbers = #tpu.dot_dimension_numbers<[1], [0], [0], [1], [0, 0, 1, 1], [], []>} : vector<8x4xbf16>, vector<4x32xbf16>, vector<8x32xf32> -> vector<8x32xf32>
    %132 = arith.addf %128, %131 : vector<8x32xf32>
    %cst_89 = arith.constant 0.000000e+00 : f32
    %133 = vector.broadcast %cst_89 : f32 to vector<8x32xf32>
    %134 = arith.maximumf %132, %133 : vector<8x32xf32>
    %135 = arith.truncf %134 : vector<8x32xf32> to vector<8x32xbf16>
    %cst_90 = arith.constant dense<0.000000e+00> : vector<16x32xf32>
    %136 = tpu.matmul %8, %135, %cst_90 {dimension_numbers = #tpu.dot_dimension_numbers<[1], [0], [0], [1], [0, 0, 1, 1], [], []>} : vector<16x8xbf16>, vector<8x32xbf16>, vector<16x32xf32> -> vector<16x32xf32>
    %137 = arith.addf %136, %11 : vector<16x32xf32>
    %cst_91 = arith.constant 0.000000e+00 : f32
    %138 = vector.broadcast %cst_91 : f32 to vector<16x32xf32>
    %139 = arith.maximumf %137, %138 : vector<16x32xf32>
    %140 = arith.maximumf %124, %139 : vector<16x32xf32>
    %c0_92 = arith.constant 0 : index
    %c0_93 = arith.constant 0 : index
    %141 = vector.load %arg9[%c0_92, %c0_93] : memref<16x32xf32, #tpu.memory_space<vmem>>, vector<16x32xf32>
    tpu.vector_store %arg9[%c0_92, %c0_93], %140 {strides = array<i32>} : memref<16x32xf32, #tpu.memory_space<vmem>>, vector<16x32xf32>,
    return
  }
  func.func @transform_0(%arg0: i32, %arg1: i32) -> (i32, i32, i32) {
    %c0_i32 = arith.constant 0 : i32
    %c0_i32_0 = arith.constant 0 : i32
    return %arg1, %c0_i32, %arg0 : i32, i32, i32
  }
  func.func @transform_1(%arg0: i32, %arg1: i32) -> (i32, i32, i32) {
    %c0_i32 = arith.constant 0 : i32
    %c0_i32_0 = arith.constant 0 : i32
    return %arg1, %c0_i32, %arg0 : i32, i32, i32
  }
  func.func @transform_2(%arg0: i32, %arg1: i32) -> (i32, i32) {
    %c0_i32 = arith.constant 0 : i32
    %c0_i32_0 = arith.constant 0 : i32
    %c0_i32_1 = arith.constant 0 : i32
    return %c0_i32, %c0_i32_0 : i32, i32
  }
  func.func @transform_3(%arg0: i32, %arg1: i32) -> (i32, i32) {
    %c0_i32 = arith.constant 0 : i32
    %c0_i32_0 = arith.constant 0 : i32
    %c0_i32_1 = arith.constant 0 : i32
    return %c0_i32, %c0_i32_0 : i32, i32
  }
  func.func @transform_4(%arg0: i32, %arg1: i32) -> (i32, i32) {
    %c0_i32 = arith.constant 0 : i32
    %c0_i32_0 = arith.constant 0 : i32
    %c0_i32_1 = arith.constant 0 : i32
    return %c0_i32, %c0_i32_0 : i32, i32
  }
  func.func @transform_5(%arg0: i32, %arg1: i32) -> (i32, i32) {
    %c0_i32 = arith.constant 0 : i32
    %c0_i32_0 = arith.constant 0 : i32
    %c0_i32_1 = arith.constant 0 : i32
    return %c0_i32, %c0_i32_0 : i32, i32
  }
  func.func @transform_6(%arg0: i32, %arg1: i32) -> (i32, i32) {
    %c0_i32 = arith.constant 0 : i32
    %c0_i32_0 = arith.constant 0 : i32
    %c0_i32_1 = arith.constant 0 : i32
    return %c0_i32, %c0_i32_0 : i32, i32
  }
  func.func @transform_7(%arg0: i32, %arg1: i32) -> (i32, i32) {
    %c0_i32 = arith.constant 0 : i32
    %c0_i32_0 = arith.constant 0 : i32
    return %c0_i32, %arg0 : i32, i32
  }
}

module attributes {stable_mosaic.version = 11 : i64} {
  func.func @kernel(%arg0: i32, %arg1: i32, %arg2: memref<16x3x32xbf16, #tpu.memory_space<vmem>>, %arg3: memref<16x4x32xbf16, #tpu.memory_space<vmem>>, %arg4: memref<8x3xbf16, #tpu.memory_space<vmem>>, %arg5: memref<8x4xbf16, #tpu.memory_space<vmem>>, %arg6: memref<8x1xf32, #tpu.memory_space<vmem>>, %arg7: memref<32x8xbf16, #tpu.memory_space<vmem>>, %arg8: memref<32x1xf32, #tpu.memory_space<vmem>>, %arg9: memref<32x32xf32, #tpu.memory_space<vmem>>) attributes {dimension_semantics = [#tpu.dimension_semantics<parallel>, #tpu.dimension_semantics<arbitrary>], iteration_bounds = array<i64: 1, 1>, scalar_prefetch = 0 : i64, scratch_operands = 0 : i64, tpu.core_type = #tpu.core_type<tc>, window_params = [{transform_indices = @transform_0, window_bounds = array<i64: 16, 3, 32>}, {transform_indices = @transform_1, window_bounds = array<i64: 16, 4, 32>}, {pipeline_mode = #tpu.pipeline_mode<synchronous>, transform_indices = @transform_2, window_bounds = array<i64: 8, 3>}, {pipeline_mode = #tpu.pipeline_mode<synchronous>, transform_indices = @transform_3, window_bounds = array<i64: 8, 4>}, {pipeline_mode = #tpu.pipeline_mode<synchronous>, transform_indices = @transform_4, window_bounds = array<i64: 8, 1>}, {pipeline_mode = #tpu.pipeline_mode<synchronous>, transform_indices = @transform_5, window_bounds = array<i64: 32, 8>}, {pipeline_mode = #tpu.pipeline_mode<synchronous>, transform_indices = @transform_6, window_bounds = array<i64: 32, 1>}, {transform_indices = @transform_7, window_bounds = array<i64: 32, 32>}]} {
    %c0_i32 = arith.constant 0 : i32
    %0 = arith.cmpi eq, %arg1, %c0_i32 : i32
    %1 = arith.extui %0 : i1 to i32
    %c0_i32_0 = arith.constant 0 : i32
    %2 = arith.cmpi ne, %1, %c0_i32_0 : i32
    scf.if %2 {
      %cst = arith.constant 0.000000e+00 : f32
      %16 = vector.broadcast %cst : f32 to vector<32x32xf32>
      %c0_16 = arith.constant 0 : index
      %c0_17 = arith.constant 0 : index
      %17 = vector.load %arg9[%c0_16, %c0_17] : memref<32x32xf32, #tpu.memory_space<vmem>>, vector<32x32xf32>
      tpu.vector_store %arg9[%c0_16, %c0_17], %16 {strides = array<i32>} : memref<32x32xf32, #tpu.memory_space<vmem>>, vector<32x32xf32>,
    } else {
    }
    %c0 = arith.constant 0 : index
    %c0_1 = arith.constant 0 : index
    %3 = vector.load %arg4[%c0, %c0_1] : memref<8x3xbf16, #tpu.memory_space<vmem>>, vector<8x3xbf16>
    %c0_2 = arith.constant 0 : index
    %c0_3 = arith.constant 0 : index
    %4 = vector.load %arg5[%c0_2, %c0_3] : memref<8x4xbf16, #tpu.memory_space<vmem>>, vector<8x4xbf16>
    %c0_4 = arith.constant 0 : index
    %c0_5 = arith.constant 0 : index
    %5 = vector.load %arg6[%c0_4, %c0_5] : memref<8x1xf32, #tpu.memory_space<vmem>>, vector<8x1xf32>
    %6 = vector.shape_cast %5 : vector<8x1xf32> to vector<8x1xf32>
    %7 = vector.broadcast %6 : vector<8x1xf32> to vector<8x32xf32>
    %c0_6 = arith.constant 0 : index
    %c0_7 = arith.constant 0 : index
    %8 = vector.load %arg7[%c0_6, %c0_7] : memref<32x8xbf16, #tpu.memory_space<vmem>>, vector<32x8xbf16>
    %c0_8 = arith.constant 0 : index
    %c0_9 = arith.constant 0 : index
    %9 = vector.load %arg8[%c0_8, %c0_9] : memref<32x1xf32, #tpu.memory_space<vmem>>, vector<32x1xf32>
    %10 = vector.shape_cast %9 : vector<32x1xf32> to vector<32x1xf32>
    %11 = vector.broadcast %10 : vector<32x1xf32> to vector<32x32xf32>
    %c0_10 = arith.constant 0 : index
    %c0_11 = arith.constant 0 : index
    %12 = vector.load %arg9[%c0_10, %c0_11] : memref<32x32xf32, #tpu.memory_space<vmem>>, vector<32x32xf32>
    %c0_i32_12 = arith.constant 0 : i32
    %c2_i32 = arith.constant 2 : i32
    %13 = arith.addi %c0_i32_12, %c2_i32 : i32
    %c1_i32 = arith.constant 1 : i32
    %14 = scf.for %arg10 = %c0_i32_12 to %13 step %c1_i32 iter_args(%arg11 = %12) -> (vector<32x32xf32>)  : i32 {
      %c8_i32 = arith.constant 8 : i32
      %16 = arith.muli %arg10, %c8_i32 : i32
      %c0_i32_16 = arith.constant 0 : i32
      %17 = arith.addi %16, %c0_i32_16 : i32
      %18 = arith.index_cast %17 : i32 to index
      %c0_17 = arith.constant 0 : index
      %c0_18 = arith.constant 0 : index
      %19 = vector.load %arg2[%18, %c0_17, %c0_18] : memref<16x3x32xbf16, #tpu.memory_space<vmem>>, vector<1x3x32xbf16>
      %20 = vector.shape_cast %19 : vector<1x3x32xbf16> to vector<3x32xbf16>
      %cst = arith.constant dense<0.000000e+00> : vector<8x32xf32>
      %21 = tpu.matmul %3, %20, %cst {dimension_numbers = #tpu.dot_dimension_numbers<[1], [0], [0], [1], [0, 0, 1, 1], [], []>} : vector<8x3xbf16>, vector<3x32xbf16>, vector<8x32xf32> -> vector<8x32xf32>
      %22 = arith.addf %7, %21 : vector<8x32xf32>
      %23 = arith.index_cast %17 : i32 to index
      %c0_19 = arith.constant 0 : index
      %c0_20 = arith.constant 0 : index
      %24 = vector.load %arg3[%23, %c0_19, %c0_20] : memref<16x4x32xbf16, #tpu.memory_space<vmem>>, vector<1x4x32xbf16>
      %25 = vector.shape_cast %24 : vector<1x4x32xbf16> to vector<4x32xbf16>
      %cst_21 = arith.constant dense<0.000000e+00> : vector<8x32xf32>
      %26 = tpu.matmul %4, %25, %cst_21 {dimension_numbers = #tpu.dot_dimension_numbers<[1], [0], [0], [1], [0, 0, 1, 1], [], []>} : vector<8x4xbf16>, vector<4x32xbf16>, vector<8x32xf32> -> vector<8x32xf32>
      %27 = arith.addf %22, %26 : vector<8x32xf32>
      %cst_22 = arith.constant 0.000000e+00 : f32
      %28 = vector.broadcast %cst_22 : f32 to vector<8x32xf32>
      %29 = arith.maximumf %27, %28 : vector<8x32xf32>
      %30 = arith.truncf %29 : vector<8x32xf32> to vector<8x32xbf16>
      %cst_23 = arith.constant dense<0.000000e+00> : vector<32x32xf32>
      %31 = tpu.matmul %8, %30, %cst_23 {dimension_numbers = #tpu.dot_dimension_numbers<[1], [0], [0], [1], [0, 0, 1, 1], [], []>} : vector<32x8xbf16>, vector<8x32xbf16>, vector<32x32xf32> -> vector<32x32xf32>
      %32 = arith.addf %31, %11 : vector<32x32xf32>
      %cst_24 = arith.constant 0.000000e+00 : f32
      %33 = vector.broadcast %cst_24 : f32 to vector<32x32xf32>
      %34 = arith.maximumf %32, %33 : vector<32x32xf32>
      %35 = arith.maximumf %arg11, %34 : vector<32x32xf32>
      %c8_i32_25 = arith.constant 8 : i32
      %36 = arith.muli %arg10, %c8_i32_25 : i32
      %c1_i32_26 = arith.constant 1 : i32
      %37 = arith.addi %36, %c1_i32_26 : i32
      %38 = arith.index_cast %37 : i32 to index
      %c0_27 = arith.constant 0 : index
      %c0_28 = arith.constant 0 : index
      %39 = vector.load %arg2[%38, %c0_27, %c0_28] : memref<16x3x32xbf16, #tpu.memory_space<vmem>>, vector<1x3x32xbf16>
      %40 = vector.shape_cast %39 : vector<1x3x32xbf16> to vector<3x32xbf16>
      %cst_29 = arith.constant dense<0.000000e+00> : vector<8x32xf32>
      %41 = tpu.matmul %3, %40, %cst_29 {dimension_numbers = #tpu.dot_dimension_numbers<[1], [0], [0], [1], [0, 0, 1, 1], [], []>} : vector<8x3xbf16>, vector<3x32xbf16>, vector<8x32xf32> -> vector<8x32xf32>
      %42 = arith.addf %7, %41 : vector<8x32xf32>
      %43 = arith.index_cast %37 : i32 to index
      %c0_30 = arith.constant 0 : index
      %c0_31 = arith.constant 0 : index
      %44 = vector.load %arg3[%43, %c0_30, %c0_31] : memref<16x4x32xbf16, #tpu.memory_space<vmem>>, vector<1x4x32xbf16>
      %45 = vector.shape_cast %44 : vector<1x4x32xbf16> to vector<4x32xbf16>
      %cst_32 = arith.constant dense<0.000000e+00> : vector<8x32xf32>
      %46 = tpu.matmul %4, %45, %cst_32 {dimension_numbers = #tpu.dot_dimension_numbers<[1], [0], [0], [1], [0, 0, 1, 1], [], []>} : vector<8x4xbf16>, vector<4x32xbf16>, vector<8x32xf32> -> vector<8x32xf32>
      %47 = arith.addf %42, %46 : vector<8x32xf32>
      %cst_33 = arith.constant 0.000000e+00 : f32
      %48 = vector.broadcast %cst_33 : f32 to vector<8x32xf32>
      %49 = arith.maximumf %47, %48 : vector<8x32xf32>
      %50 = arith.truncf %49 : vector<8x32xf32> to vector<8x32xbf16>
      %cst_34 = arith.constant dense<0.000000e+00> : vector<32x32xf32>
      %51 = tpu.matmul %8, %50, %cst_34 {dimension_numbers = #tpu.dot_dimension_numbers<[1], [0], [0], [1], [0, 0, 1, 1], [], []>} : vector<32x8xbf16>, vector<8x32xbf16>, vector<32x32xf32> -> vector<32x32xf32>
      %52 = arith.addf %51, %11 : vector<32x32xf32>
      %cst_35 = arith.constant 0.000000e+00 : f32
      %53 = vector.broadcast %cst_35 : f32 to vector<32x32xf32>
      %54 = arith.maximumf %52, %53 : vector<32x32xf32>
      %55 = arith.maximumf %35, %54 : vector<32x32xf32>
      %c8_i32_36 = arith.constant 8 : i32
      %56 = arith.muli %arg10, %c8_i32_36 : i32
      %c2_i32_37 = arith.constant 2 : i32
      %57 = arith.addi %56, %c2_i32_37 : i32
      %58 = arith.index_cast %57 : i32 to index
      %c0_38 = arith.constant 0 : index
      %c0_39 = arith.constant 0 : index
      %59 = vector.load %arg2[%58, %c0_38, %c0_39] : memref<16x3x32xbf16, #tpu.memory_space<vmem>>, vector<1x3x32xbf16>
      %60 = vector.shape_cast %59 : vector<1x3x32xbf16> to vector<3x32xbf16>
      %cst_40 = arith.constant dense<0.000000e+00> : vector<8x32xf32>
      %61 = tpu.matmul %3, %60, %cst_40 {dimension_numbers = #tpu.dot_dimension_numbers<[1], [0], [0], [1], [0, 0, 1, 1], [], []>} : vector<8x3xbf16>, vector<3x32xbf16>, vector<8x32xf32> -> vector<8x32xf32>
      %62 = arith.addf %7, %61 : vector<8x32xf32>
      %63 = arith.index_cast %57 : i32 to index
      %c0_41 = arith.constant 0 : index
      %c0_42 = arith.constant 0 : index
      %64 = vector.load %arg3[%63, %c0_41, %c0_42] : memref<16x4x32xbf16, #tpu.memory_space<vmem>>, vector<1x4x32xbf16>
      %65 = vector.shape_cast %64 : vector<1x4x32xbf16> to vector<4x32xbf16>
      %cst_43 = arith.constant dense<0.000000e+00> : vector<8x32xf32>
      %66 = tpu.matmul %4, %65, %cst_43 {dimension_numbers = #tpu.dot_dimension_numbers<[1], [0], [0], [1], [0, 0, 1, 1], [], []>} : vector<8x4xbf16>, vector<4x32xbf16>, vector<8x32xf32> -> vector<8x32xf32>
      %67 = arith.addf %62, %66 : vector<8x32xf32>
      %cst_44 = arith.constant 0.000000e+00 : f32
      %68 = vector.broadcast %cst_44 : f32 to vector<8x32xf32>
      %69 = arith.maximumf %67, %68 : vector<8x32xf32>
      %70 = arith.truncf %69 : vector<8x32xf32> to vector<8x32xbf16>
      %cst_45 = arith.constant dense<0.000000e+00> : vector<32x32xf32>
      %71 = tpu.matmul %8, %70, %cst_45 {dimension_numbers = #tpu.dot_dimension_numbers<[1], [0], [0], [1], [0, 0, 1, 1], [], []>} : vector<32x8xbf16>, vector<8x32xbf16>, vector<32x32xf32> -> vector<32x32xf32>
      %72 = arith.addf %71, %11 : vector<32x32xf32>
      %cst_46 = arith.constant 0.000000e+00 : f32
      %73 = vector.broadcast %cst_46 : f32 to vector<32x32xf32>
      %74 = arith.maximumf %72, %73 : vector<32x32xf32>
      %75 = arith.maximumf %55, %74 : vector<32x32xf32>
      %c8_i32_47 = arith.constant 8 : i32
      %76 = arith.muli %arg10, %c8_i32_47 : i32
      %c3_i32 = arith.constant 3 : i32
      %77 = arith.addi %76, %c3_i32 : i32
      %78 = arith.index_cast %77 : i32 to index
      %c0_48 = arith.constant 0 : index
      %c0_49 = arith.constant 0 : index
      %79 = vector.load %arg2[%78, %c0_48, %c0_49] : memref<16x3x32xbf16, #tpu.memory_space<vmem>>, vector<1x3x32xbf16>
      %80 = vector.shape_cast %79 : vector<1x3x32xbf16> to vector<3x32xbf16>
      %cst_50 = arith.constant dense<0.000000e+00> : vector<8x32xf32>
      %81 = tpu.matmul %3, %80, %cst_50 {dimension_numbers = #tpu.dot_dimension_numbers<[1], [0], [0], [1], [0, 0, 1, 1], [], []>} : vector<8x3xbf16>, vector<3x32xbf16>, vector<8x32xf32> -> vector<8x32xf32>
      %82 = arith.addf %7, %81 : vector<8x32xf32>
      %83 = arith.index_cast %77 : i32 to index
      %c0_51 = arith.constant 0 : index
      %c0_52 = arith.constant 0 : index
      %84 = vector.load %arg3[%83, %c0_51, %c0_52] : memref<16x4x32xbf16, #tpu.memory_space<vmem>>, vector<1x4x32xbf16>
      %85 = vector.shape_cast %84 : vector<1x4x32xbf16> to vector<4x32xbf16>
      %cst_53 = arith.constant dense<0.000000e+00> : vector<8x32xf32>
      %86 = tpu.matmul %4, %85, %cst_53 {dimension_numbers = #tpu.dot_dimension_numbers<[1], [0], [0], [1], [0, 0, 1, 1], [], []>} : vector<8x4xbf16>, vector<4x32xbf16>, vector<8x32xf32> -> vector<8x32xf32>
      %87 = arith.addf %82, %86 : vector<8x32xf32>
      %cst_54 = arith.constant 0.000000e+00 : f32
      %88 = vector.broadcast %cst_54 : f32 to vector<8x32xf32>
      %89 = arith.maximumf %87, %88 : vector<8x32xf32>
      %90 = arith.truncf %89 : vector<8x32xf32> to vector<8x32xbf16>
      %cst_55 = arith.constant dense<0.000000e+00> : vector<32x32xf32>
      %91 = tpu.matmul %8, %90, %cst_55 {dimension_numbers = #tpu.dot_dimension_numbers<[1], [0], [0], [1], [0, 0, 1, 1], [], []>} : vector<32x8xbf16>, vector<8x32xbf16>, vector<32x32xf32> -> vector<32x32xf32>
      %92 = arith.addf %91, %11 : vector<32x32xf32>
      %cst_56 = arith.constant 0.000000e+00 : f32
      %93 = vector.broadcast %cst_56 : f32 to vector<32x32xf32>
      %94 = arith.maximumf %92, %93 : vector<32x32xf32>
      %95 = arith.maximumf %75, %94 : vector<32x32xf32>
      %c8_i32_57 = arith.constant 8 : i32
      %96 = arith.muli %arg10, %c8_i32_57 : i32
      %c4_i32 = arith.constant 4 : i32
      %97 = arith.addi %96, %c4_i32 : i32
      %98 = arith.index_cast %97 : i32 to index
      %c0_58 = arith.constant 0 : index
      %c0_59 = arith.constant 0 : index
      %99 = vector.load %arg2[%98, %c0_58, %c0_59] : memref<16x3x32xbf16, #tpu.memory_space<vmem>>, vector<1x3x32xbf16>
      %100 = vector.shape_cast %99 : vector<1x3x32xbf16> to vector<3x32xbf16>
      %cst_60 = arith.constant dense<0.000000e+00> : vector<8x32xf32>
      %101 = tpu.matmul %3, %100, %cst_60 {dimension_numbers = #tpu.dot_dimension_numbers<[1], [0], [0], [1], [0, 0, 1, 1], [], []>} : vector<8x3xbf16>, vector<3x32xbf16>, vector<8x32xf32> -> vector<8x32xf32>
      %102 = arith.addf %7, %101 : vector<8x32xf32>
      %103 = arith.index_cast %97 : i32 to index
      %c0_61 = arith.constant 0 : index
      %c0_62 = arith.constant 0 : index
      %104 = vector.load %arg3[%103, %c0_61, %c0_62] : memref<16x4x32xbf16, #tpu.memory_space<vmem>>, vector<1x4x32xbf16>
      %105 = vector.shape_cast %104 : vector<1x4x32xbf16> to vector<4x32xbf16>
      %cst_63 = arith.constant dense<0.000000e+00> : vector<8x32xf32>
      %106 = tpu.matmul %4, %105, %cst_63 {dimension_numbers = #tpu.dot_dimension_numbers<[1], [0], [0], [1], [0, 0, 1, 1], [], []>} : vector<8x4xbf16>, vector<4x32xbf16>, vector<8x32xf32> -> vector<8x32xf32>
      %107 = arith.addf %102, %106 : vector<8x32xf32>
      %cst_64 = arith.constant 0.000000e+00 : f32
      %108 = vector.broadcast %cst_64 : f32 to vector<8x32xf32>
      %109 = arith.maximumf %107, %108 : vector<8x32xf32>
      %110 = arith.truncf %109 : vector<8x32xf32> to vector<8x32xbf16>
      %cst_65 = arith.constant dense<0.000000e+00> : vector<32x32xf32>
      %111 = tpu.matmul %8, %110, %cst_65 {dimension_numbers = #tpu.dot_dimension_numbers<[1], [0], [0], [1], [0, 0, 1, 1], [], []>} : vector<32x8xbf16>, vector<8x32xbf16>, vector<32x32xf32> -> vector<32x32xf32>
      %112 = arith.addf %111, %11 : vector<32x32xf32>
      %cst_66 = arith.constant 0.000000e+00 : f32
      %113 = vector.broadcast %cst_66 : f32 to vector<32x32xf32>
      %114 = arith.maximumf %112, %113 : vector<32x32xf32>
      %115 = arith.maximumf %95, %114 : vector<32x32xf32>
      %c8_i32_67 = arith.constant 8 : i32
      %116 = arith.muli %arg10, %c8_i32_67 : i32
      %c5_i32 = arith.constant 5 : i32
      %117 = arith.addi %116, %c5_i32 : i32
      %118 = arith.index_cast %117 : i32 to index
      %c0_68 = arith.constant 0 : index
      %c0_69 = arith.constant 0 : index
      %119 = vector.load %arg2[%118, %c0_68, %c0_69] : memref<16x3x32xbf16, #tpu.memory_space<vmem>>, vector<1x3x32xbf16>
      %120 = vector.shape_cast %119 : vector<1x3x32xbf16> to vector<3x32xbf16>
      %cst_70 = arith.constant dense<0.000000e+00> : vector<8x32xf32>
      %121 = tpu.matmul %3, %120, %cst_70 {dimension_numbers = #tpu.dot_dimension_numbers<[1], [0], [0], [1], [0, 0, 1, 1], [], []>} : vector<8x3xbf16>, vector<3x32xbf16>, vector<8x32xf32> -> vector<8x32xf32>
      %122 = arith.addf %7, %121 : vector<8x32xf32>
      %123 = arith.index_cast %117 : i32 to index
      %c0_71 = arith.constant 0 : index
      %c0_72 = arith.constant 0 : index
      %124 = vector.load %arg3[%123, %c0_71, %c0_72] : memref<16x4x32xbf16, #tpu.memory_space<vmem>>, vector<1x4x32xbf16>
      %125 = vector.shape_cast %124 : vector<1x4x32xbf16> to vector<4x32xbf16>
      %cst_73 = arith.constant dense<0.000000e+00> : vector<8x32xf32>
      %126 = tpu.matmul %4, %125, %cst_73 {dimension_numbers = #tpu.dot_dimension_numbers<[1], [0], [0], [1], [0, 0, 1, 1], [], []>} : vector<8x4xbf16>, vector<4x32xbf16>, vector<8x32xf32> -> vector<8x32xf32>
      %127 = arith.addf %122, %126 : vector<8x32xf32>
      %cst_74 = arith.constant 0.000000e+00 : f32
      %128 = vector.broadcast %cst_74 : f32 to vector<8x32xf32>
      %129 = arith.maximumf %127, %128 : vector<8x32xf32>
      %130 = arith.truncf %129 : vector<8x32xf32> to vector<8x32xbf16>
      %cst_75 = arith.constant dense<0.000000e+00> : vector<32x32xf32>
      %131 = tpu.matmul %8, %130, %cst_75 {dimension_numbers = #tpu.dot_dimension_numbers<[1], [0], [0], [1], [0, 0, 1, 1], [], []>} : vector<32x8xbf16>, vector<8x32xbf16>, vector<32x32xf32> -> vector<32x32xf32>
      %132 = arith.addf %131, %11 : vector<32x32xf32>
      %cst_76 = arith.constant 0.000000e+00 : f32
      %133 = vector.broadcast %cst_76 : f32 to vector<32x32xf32>
      %134 = arith.maximumf %132, %133 : vector<32x32xf32>
      %135 = arith.maximumf %115, %134 : vector<32x32xf32>
      %c8_i32_77 = arith.constant 8 : i32
      %136 = arith.muli %arg10, %c8_i32_77 : i32
      %c6_i32 = arith.constant 6 : i32
      %137 = arith.addi %136, %c6_i32 : i32
      %138 = arith.index_cast %137 : i32 to index
      %c0_78 = arith.constant 0 : index
      %c0_79 = arith.constant 0 : index
      %139 = vector.load %arg2[%138, %c0_78, %c0_79] : memref<16x3x32xbf16, #tpu.memory_space<vmem>>, vector<1x3x32xbf16>
      %140 = vector.shape_cast %139 : vector<1x3x32xbf16> to vector<3x32xbf16>
      %cst_80 = arith.constant dense<0.000000e+00> : vector<8x32xf32>
      %141 = tpu.matmul %3, %140, %cst_80 {dimension_numbers = #tpu.dot_dimension_numbers<[1], [0], [0], [1], [0, 0, 1, 1], [], []>} : vector<8x3xbf16>, vector<3x32xbf16>, vector<8x32xf32> -> vector<8x32xf32>
      %142 = arith.addf %7, %141 : vector<8x32xf32>
      %143 = arith.index_cast %137 : i32 to index
      %c0_81 = arith.constant 0 : index
      %c0_82 = arith.constant 0 : index
      %144 = vector.load %arg3[%143, %c0_81, %c0_82] : memref<16x4x32xbf16, #tpu.memory_space<vmem>>, vector<1x4x32xbf16>
      %145 = vector.shape_cast %144 : vector<1x4x32xbf16> to vector<4x32xbf16>
      %cst_83 = arith.constant dense<0.000000e+00> : vector<8x32xf32>
      %146 = tpu.matmul %4, %145, %cst_83 {dimension_numbers = #tpu.dot_dimension_numbers<[1], [0], [0], [1], [0, 0, 1, 1], [], []>} : vector<8x4xbf16>, vector<4x32xbf16>, vector<8x32xf32> -> vector<8x32xf32>
      %147 = arith.addf %142, %146 : vector<8x32xf32>
      %cst_84 = arith.constant 0.000000e+00 : f32
      %148 = vector.broadcast %cst_84 : f32 to vector<8x32xf32>
      %149 = arith.maximumf %147, %148 : vector<8x32xf32>
      %150 = arith.truncf %149 : vector<8x32xf32> to vector<8x32xbf16>
      %cst_85 = arith.constant dense<0.000000e+00> : vector<32x32xf32>
      %151 = tpu.matmul %8, %150, %cst_85 {dimension_numbers = #tpu.dot_dimension_numbers<[1], [0], [0], [1], [0, 0, 1, 1], [], []>} : vector<32x8xbf16>, vector<8x32xbf16>, vector<32x32xf32> -> vector<32x32xf32>
      %152 = arith.addf %151, %11 : vector<32x32xf32>
      %cst_86 = arith.constant 0.000000e+00 : f32
      %153 = vector.broadcast %cst_86 : f32 to vector<32x32xf32>
      %154 = arith.maximumf %152, %153 : vector<32x32xf32>
      %155 = arith.maximumf %135, %154 : vector<32x32xf32>
      %c8_i32_87 = arith.constant 8 : i32
      %156 = arith.muli %arg10, %c8_i32_87 : i32
      %c7_i32 = arith.constant 7 : i32
      %157 = arith.addi %156, %c7_i32 : i32
      %158 = arith.index_cast %157 : i32 to index
      %c0_88 = arith.constant 0 : index
      %c0_89 = arith.constant 0 : index
      %159 = vector.load %arg2[%158, %c0_88, %c0_89] : memref<16x3x32xbf16, #tpu.memory_space<vmem>>, vector<1x3x32xbf16>
      %160 = vector.shape_cast %159 : vector<1x3x32xbf16> to vector<3x32xbf16>
      %cst_90 = arith.constant dense<0.000000e+00> : vector<8x32xf32>
      %161 = tpu.matmul %3, %160, %cst_90 {dimension_numbers = #tpu.dot_dimension_numbers<[1], [0], [0], [1], [0, 0, 1, 1], [], []>} : vector<8x3xbf16>, vector<3x32xbf16>, vector<8x32xf32> -> vector<8x32xf32>
      %162 = arith.addf %7, %161 : vector<8x32xf32>
      %163 = arith.index_cast %157 : i32 to index
      %c0_91 = arith.constant 0 : index
      %c0_92 = arith.constant 0 : index
      %164 = vector.load %arg3[%163, %c0_91, %c0_92] : memref<16x4x32xbf16, #tpu.memory_space<vmem>>, vector<1x4x32xbf16>
      %165 = vector.shape_cast %164 : vector<1x4x32xbf16> to vector<4x32xbf16>
      %cst_93 = arith.constant dense<0.000000e+00> : vector<8x32xf32>
      %166 = tpu.matmul %4, %165, %cst_93 {dimension_numbers = #tpu.dot_dimension_numbers<[1], [0], [0], [1], [0, 0, 1, 1], [], []>} : vector<8x4xbf16>, vector<4x32xbf16>, vector<8x32xf32> -> vector<8x32xf32>
      %167 = arith.addf %162, %166 : vector<8x32xf32>
      %cst_94 = arith.constant 0.000000e+00 : f32
      %168 = vector.broadcast %cst_94 : f32 to vector<8x32xf32>
      %169 = arith.maximumf %167, %168 : vector<8x32xf32>
      %170 = arith.truncf %169 : vector<8x32xf32> to vector<8x32xbf16>
      %cst_95 = arith.constant dense<0.000000e+00> : vector<32x32xf32>
      %171 = tpu.matmul %8, %170, %cst_95 {dimension_numbers = #tpu.dot_dimension_numbers<[1], [0], [0], [1], [0, 0, 1, 1], [], []>} : vector<32x8xbf16>, vector<8x32xbf16>, vector<32x32xf32> -> vector<32x32xf32>
      %172 = arith.addf %171, %11 : vector<32x32xf32>
      %cst_96 = arith.constant 0.000000e+00 : f32
      %173 = vector.broadcast %cst_96 : f32 to vector<32x32xf32>
      %174 = arith.maximumf %172, %173 : vector<32x32xf32>
      %175 = arith.maximumf %155, %174 : vector<32x32xf32>
      scf.yield %175 : vector<32x32xf32>
    }
    %c2_i32_13 = arith.constant 2 : i32
    %c0_14 = arith.constant 0 : index
    %c0_15 = arith.constant 0 : index
    %15 = vector.load %arg9[%c0_14, %c0_15] : memref<32x32xf32, #tpu.memory_space<vmem>>, vector<32x32xf32>
    tpu.vector_store %arg9[%c0_14, %c0_15], %14 {strides = array<i32>} : memref<32x32xf32, #tpu.memory_space<vmem>>, vector<32x32xf32>,
    return
  }
  func.func @transform_0(%arg0: i32, %arg1: i32) -> (i32, i32, i32) {
    %c0_i32 = arith.constant 0 : i32
    %c0_i32_0 = arith.constant 0 : i32
    return %arg1, %c0_i32, %arg0 : i32, i32, i32
  }
  func.func @transform_1(%arg0: i32, %arg1: i32) -> (i32, i32, i32) {
    %c0_i32 = arith.constant 0 : i32
    %c0_i32_0 = arith.constant 0 : i32
    return %arg1, %c0_i32, %arg0 : i32, i32, i32
  }
  func.func @transform_2(%arg0: i32, %arg1: i32) -> (i32, i32) {
    %c0_i32 = arith.constant 0 : i32
    %c0_i32_0 = arith.constant 0 : i32
    %c0_i32_1 = arith.constant 0 : i32
    return %c0_i32, %c0_i32_0 : i32, i32
  }
  func.func @transform_3(%arg0: i32, %arg1: i32) -> (i32, i32) {
    %c0_i32 = arith.constant 0 : i32
    %c0_i32_0 = arith.constant 0 : i32
    %c0_i32_1 = arith.constant 0 : i32
    return %c0_i32, %c0_i32_0 : i32, i32
  }
  func.func @transform_4(%arg0: i32, %arg1: i32) -> (i32, i32) {
    %c0_i32 = arith.constant 0 : i32
    %c0_i32_0 = arith.constant 0 : i32
    %c0_i32_1 = arith.constant 0 : i32
    return %c0_i32, %c0_i32_0 : i32, i32
  }
  func.func @transform_5(%arg0: i32, %arg1: i32) -> (i32, i32) {
    %c0_i32 = arith.constant 0 : i32
    %c0_i32_0 = arith.constant 0 : i32
    %c0_i32_1 = arith.constant 0 : i32
    return %c0_i32, %c0_i32_0 : i32, i32
  }
  func.func @transform_6(%arg0: i32, %arg1: i32) -> (i32, i32) {
    %c0_i32 = arith.constant 0 : i32
    %c0_i32_0 = arith.constant 0 : i32
    %c0_i32_1 = arith.constant 0 : i32
    return %c0_i32, %c0_i32_0 : i32, i32
  }
  func.func @transform_7(%arg0: i32, %arg1: i32) -> (i32, i32) {
    %c0_i32 = arith.constant 0 : i32
    %c0_i32_0 = arith.constant 0 : i32
    return %c0_i32, %arg0 : i32, i32
  }
}

</mosaic_0001>

<bundles_post_ra>
// kernel: custom-call.4
= control target key start
LH: loop header
LB: loop body
LE: loop exit
PB: predicated region body
PF: predicated region fallthrough
CT: control target
= control target key end

     0   :  { %s6_s0 = inlined_call_operand.vmem [shape: f32[2,64], index: 0, kind: output, shape index: {}]  }

// kernel: sub.41
= control target key start
LH: loop header
LB: loop body
LE: loop exit
PB: predicated region body
PF: predicated region fallthrough
CT: control target
= control target key end

     0   :  { %vm17_vm0 = vcmask 130048   ;;  %vm23_vm1 = vcmask 261248   ;;  %s60_s0 = inlined_call_operand.vmem [shape: f32[3,2,16], index: 0, kind: input, shape index: {}]   ;;  %s61_s1 = inlined_call_operand.vmem [shape: f32[3,32], index: 1, kind: output, shape index: {}]  }
   0x1   :  { %v34_v0 = vld [vmem:[%s60_s0 + $0x4] sm:$0x3]  ;;  %v35_v1 = vld [vmem:[%s60_s0 + $0x2] sm:$0x3]  ;;  %v14_v2 = vld [vmem:[%s60_s0] sm:$0x3] }
   0x2   :  { %9 = vst [vmem:[#allocation1 + $0x10] sm:$0x3] %v34_v0  ;;  %13 = vst [vmem:[#allocation1 + $0x8] sm:$0x3] %v35_v1  ;;  %s37_s0 = smov 16  }
   0x3   :  { %15 = vst [vmem:[#allocation1] sm:$0x3] %v14_v2 }
   0xa   :  { %v20_v3 = vld [vmem:[#allocation1 + $0x1] ss:$8 sm:$0x7]   ;;  %v16_v4 = vld [vmem:[#allocation1] ss:$8 sm:$0x7]  }
   0xb   :  { %21 = vrot.lane.b32.xlu0 %v20_v3, %s37_s0  ;;  %18 = vst.msk [vmem:[#allocation0] sm:$0x7] %vm17_vm0, %v16_v4  }
  0x7d   :  { %v22_v5 = vpop.permute.xlu0 %21  }
  0x7e   :  { %24 = vst.msk [vmem:[#allocation0] sm:$0x7] %vm23_vm1, %v22_v5  }
  0x85   :  { %v29_v6 = vld [vmem:[#allocation0] sm:$0xf] }
  0x86   :  { %32 = vst [vmem:[%s61_s1] sm:$0xf] %v29_v6 }

// kernel: a_call__.2
= control target key start
LH: loop header
LB: loop body
LE: loop exit
PB: predicated region body
PF: predicated region fallthrough
CT: control target
= control target key end

     0   :  { %vm64_vm0 = vcmask 1041408   ;;  %vm63_vm1 = vcmask 1040384   ;;  %v1459_v0 = vmov 0.0   ;;  %v1460_v3 = vmov 65535   ;;  %s1776_s1 = inlined_call_operand.vmem [shape: bf16[8,4,32], index: 1, kind: input, shape index: {}]   ;;  %s1777_s0 = inlined_call_operand.vmem [shape: bf16[8,3,32], index: 0, kind: input, shape index: {}]   ;;  %s1778_s3 = inlined_call_operand.vmem [shape: bf16[8,4], index: 3, kind: input, shape index: {}]   ;;  %s1779_s4 = inlined_call_operand.vmem [shape: f32[8,1], index: 4, kind: input, shape index: {}]   ;;  %s1780_s2 = inlined_call_operand.vmem [shape: bf16[8,3], index: 2, kind: input, shape index: {}]   ;;  %s1781_s6 = inlined_call_operand.vmem [shape: f32[16,1], index: 6, kind: input, shape index: {}]   ;;  %s1782_s5 = inlined_call_operand.vmem [shape: bf16[16,8], index: 5, kind: input, shape index: {}]   ;;  %s1783_s7 = inlined_call_operand.vmem [shape: f32[16,32], index: 7, kind: output, shape index: {}]  }
   0x1   :  { %1314 = vmatprep.subr.bf16.mxu1 %v1459_v0  ;;  %v111_v1 = vld [vmem:[%s1776_s1] sm:$0x3]  ;;  %1308 = vmatprep.subr.bf16.mxu0 %v1459_v0  ;;  %v65_v4 = vsel %vm63_vm1, 4294967295, %v1460_v3  ;;  %vm1461_vm2 = vmmov 0   ;;  %vm112_vm3 = vcmask 31744   ;;  %v1462_v12 = vmov 0  }
   0x2   :  { %v58_v2 = vld [vmem:[%s1777_s0] sm:$0x3]  ;;  %v117_v5 = vsel %vm64_vm0, %v111_v1, 0  ;;  %v1513_v6 = vsel %vm64_vm0, %v65_v4, 0  ;;  %1316 = vmatprep.mubr.msk.bf16.mxu1 %vm1461_vm2, %v1459_v0  ;;  %1310 = vmatprep.mubr.msk.bf16.mxu0 %vm1461_vm2, %v1459_v0  ;;  %v1225_v9 = vld [vmem:[%s1777_s0 + $0x2] sm:$0x3] }
   0x3   :  { %v1520_v7 = vld [vmem:[%s1778_s3] sm:$0xf]  ;;  %1315 = vmatpush3.bf16.msra.mxu1 %v117_v5  ;;  %v68_v8 = vand.u32 %v1513_v6, %v58_v2  ;;  %v223_v11 = vand.u32 %v1225_v9, %v1513_v6  ;;  %1456 = vset.pattern.permute.xlu0 %v1462_v12  ;;  %vm59_vm4 = vcmask 23552   ;;  %v45_v15 = vld [vmem:[%s1781_s6 + $0x8] sm:$0xff]  ;;  %vm31_vm5 = vcmask 261120  }
   0x4   :  { %v36_v10 = vld [vmem:[%s1779_s4] sm:$0xff]  ;;  %1326 = vmatprep.subr.bf16.mxu1 %v1459_v0  ;;  %1457 = vset.pattern.permute.xlu1 %v1462_v12  ;;  %32 = vst.msk [vmem:[%s1783_s7] sm:$0xff] %vm31_vm5, %v1459_v0  ;;  %33 = vst.msk [vmem:[%s1783_s7 + $0x8] sm:$0xff] %vm31_vm5, %v1459_v0  ;;  %vm171_vm6 = vcmask 1043456   ;;  %vm167_vm7 = vcmask 64512  }
   0x5   :  { %1309 = vmatpush3.bf16.msra.mxu0 %v68_v8  ;;  %v1536_v13 = vld [vmem:[%s1780_s2] sm:$0xf]  ;;  %39 = vperm.xlu0 %1456, %v36_v10   ;;  %v1230_v37 = vld [vmem:[%s1777_s0 + $0x4] sm:$0x3]  ;;  %v1235_v57 = vld [vmem:[%s1777_s0 + $0x6] sm:$0x3] }
   0x6   :  { %1317 = vmatmul.mubr.msk.bf16.vlgmr.msra.gmra.mxu1 %vm112_vm3, %v1520_v7  ;;  %v44_v14 = vld [vmem:[%s1781_s6] sm:$0xff]  ;;  %1320 = vmatprep.subr.bf16.mxu0 %v1459_v0  ;;  %v365_v38 = vand.u32 %v1230_v37, %v1513_v6  ;;  %v507_v59 = vand.u32 %v1235_v57, %v1513_v6  ;;  %v1242_v57 = vld [vmem:[%s1776_s1 + $0x8] sm:$0x3] }
   0x7   :  { %1327 = vmatpush3.bf16.msra.mxu1 %v223_v11  ;;  %1328 = vmatprep.mubr.msk.bf16.mxu1 %vm1461_vm2, %v1459_v0  ;;  %v1227_v30 = vld [vmem:[%s1776_s1 + $0x2] sm:$0x3]  ;;  %v1232_v51 = vld [vmem:[%s1776_s1 + $0x4] sm:$0x3] }
   0x8   :  { %1311 = vmatmul.mubr.msk.bf16.vlgmr.msra.gmra.mxu0 %vm59_vm4, %v1536_v13  ;;  %1338 = vmatprep.subr.bf16.mxu1 %v1459_v0  ;;  %v1578_v33 = vld [vmem:[%s1782_s5] sm:$0xff]   ;;  %v269_v35 = vsel %vm64_vm0, %v1227_v30, 0  ;;  %v411_v54 = vsel %vm64_vm0, %v1232_v51, 0 }
   0x9   :  { %48 = vperm.xlu0 %1456, %v44_v14   ;;  %1322 = vmatprep.mubr.msk.bf16.mxu0 %vm1461_vm2, %v1459_v0 }
   0xa   :  { %53 = vperm.xlu1 %1457, %v45_v15  }
   0xb   :  { %v56_v2 = vld [vmem:[%s1783_s7] sm:$0xff]  ;;  %v57_v11 = vld [vmem:[%s1783_s7 + $0x8] sm:$0xff] }
   0xe   :  { %1329 = vmatmul.mubr.msk.bf16.vlgmr.msra.gmra.mxu1 %vm59_vm4, %v1536_v13 }
   0xf   :  { %1340 = vmatprep.mubr.msk.bf16.mxu1 %vm1461_vm2, %v1459_v0 }
  0x80   :  { %v1568_v17 = vpop.permute.xlu0 %39 }
  0x84   :  { %v1625_v60 = vpop.permute.xlu0 %48 }
  0x85   :  { %v1628_v62 = vpop.permute.xlu1 %53 }
  0xc6   :  { %v153_v16 = vpop.f32.mrf.mxu1 }
  0xc8   :  { %v104_v18 = vpop.f32.mrf.mxu0  ;;  %v1318_v19 = vpop.f32.mrf.mxu1 }
  0xc9   :  { %v110_v20 = vadd.f32 %v104_v18, %v1568_v17 }
  0xca   :  { %v1312_v21 = vpop.f32.mrf.mxu0  ;;  %v156_v22 = vpop.f32.mrf.mxu1 }
  0xcb   :  { %v159_v23 = vadd.f32 %v153_v16, %v110_v20 }
  0xcc   :  { %v107_v24 = vpop.f32.mrf.mxu0  ;;  %v1319_v25 = vpop.f32.mrf.mxu1 }
  0xcd   :  { %v160_v26 = vmax.f32 %v159_v23, 0.0 }
  0xce   :  { %v1313_v27 = vpop.f32.mrf.mxu0  ;;  %v259_v28 = vpop.f32.mrf.mxu1 }
  0xcf   :  { %v161_v29 = vpack.c.bf16 %v160_v26, %v160_v26  ;;  %v265_v43 = vadd.f32 %v259_v28, %v1568_v17 }
  0xd0   :  { %v1330_v31 = vpop.f32.mrf.mxu1 }
  0xd1   :  { %v173_v32 = vsel %vm171_vm6, %v161_v29, 0  ;;  %v1237_v29 = vld [vmem:[%s1776_s1 + $0x6] sm:$0x3] }
  0xd2   :  { %1321 = vmatpush3.bf16.msra.mxu0 %v173_v32  ;;  %v262_v34 = vpop.f32.mrf.mxu1  ;;  %v553_v32 = vsel %vm64_vm0, %v1237_v29, 0 }
  0xd3   :  { %1332 = vmatprep.subr.bf16.mxu0 %v1459_v0 }
  0xd4   :  { %v1331_v36 = vpop.f32.mrf.mxu1 }
  0xd5   :  { %1323 = vmatmul.mubr.msk.bf16.vlgmr.msra.gmra.mxu0 %vm167_vm7, %v1578_v33  ;;  %v1240_v36 = vld [vmem:[%s1777_s0 + $0x8] sm:$0x3] }
  0xd6   :  { %1333 = vmatpush3.bf16.msra.mxu0 %v269_v35  ;;  %1334 = vmatprep.mubr.msk.bf16.mxu0 %vm1461_vm2, %v1459_v0 }
  0xd7   :  { %1344 = vmatprep.subr.bf16.mxu0 %v1459_v0 }
  0xdd   :  { %1335 = vmatmul.mubr.msk.bf16.vlgmr.msra.gmra.mxu0 %vm112_vm3, %v1520_v7 }
  0xde   :  { %1345 = vmatpush3.bf16.msra.mxu0 %v365_v38  ;;  %1346 = vmatprep.mubr.msk.bf16.mxu0 %vm1461_vm2, %v1459_v0  ;;  %v649_v38 = vand.u32 %v1240_v36, %v1513_v6 }
  0xdf   :  { %1356 = vmatprep.subr.bf16.mxu0 %v1459_v0 }
  0xe5   :  { %1347 = vmatmul.mubr.msk.bf16.vlgmr.msra.gmra.mxu0 %vm59_vm4, %v1536_v13 }
  0xe6   :  { %1358 = vmatprep.mubr.msk.bf16.mxu0 %vm1461_vm2, %v1459_v0 }
 0x195   :  { %v209_v39 = vpop.f32.mrf.mxu0 }
 0x196   :  { %v210_v61 = vadd.f32 %v209_v39, %v1625_v60 }
 0x197   :  { %v1324_v40 = vpop.f32.mrf.mxu0 }
 0x198   :  { %v216_v63 = vmax.f32 %v210_v61, 0.0  ;;  %v695_v61 = vsel %vm64_vm0, %v1242_v57, 0 }
 0x199   :  { %v212_v41 = vpop.f32.mrf.mxu0 }
 0x19a   :  { %v213_v1 = vadd.f32 %v212_v41, %v1628_v62  ;;  %v218_v8 = vmax.f32 %v56_v2, %v216_v63  ;;  %v1245_v2 = vld [vmem:[%s1777_s0 + $0xa] sm:$0x3] }
 0x19b   :  { %v1325_v42 = vpop.f32.mrf.mxu0 }
 0x19c   :  { %v217_v9 = vmax.f32 %v213_v1, 0.0 }
 0x19d   :  { %v305_v44 = vpop.f32.mrf.mxu0 }
 0x19e   :  { %v311_v45 = vadd.f32 %v305_v44, %v265_v43  ;;  %v219_v18 = vmax.f32 %v57_v11, %v217_v9 }
 0x19f   :  { %v1336_v46 = vpop.f32.mrf.mxu0 }
 0x1a0   :  { %v312_v47 = vmax.f32 %v311_v45, 0.0 }
 0x1a1   :  { %v308_v48 = vpop.f32.mrf.mxu0 }
 0x1a2   :  { %v313_v49 = vpack.c.bf16 %v312_v47, %v312_v47 }
 0x1a3   :  { %v1337_v50 = vpop.f32.mrf.mxu0 }
 0x1a4   :  { %v315_v52 = vsel %vm171_vm6, %v313_v49, 0 }
 0x1a5   :  { %1339 = vmatpush3.bf16.msra.mxu1 %v315_v52  ;;  %v401_v53 = vpop.f32.mrf.mxu0 }
 0x1a6   :  { %1350 = vmatprep.subr.bf16.mxu1 %v1459_v0  ;;  %v407_v19 = vadd.f32 %v401_v53, %v1568_v17 }
 0x1a7   :  { %v1348_v55 = vpop.f32.mrf.mxu0 }
 0x1a8   :  { %1341 = vmatmul.mubr.msk.bf16.vlgmr.msra.gmra.mxu1 %vm167_vm7, %v1578_v33 }
 0x1a9   :  { %1351 = vmatpush3.bf16.msra.mxu1 %v411_v54  ;;  %1352 = vmatprep.mubr.msk.bf16.mxu1 %vm1461_vm2, %v1459_v0  ;;  %v404_v56 = vpop.f32.mrf.mxu0 }
 0x1aa   :  { %1362 = vmatprep.subr.bf16.mxu1 %v1459_v0 }
 0x1ab   :  { %v1349_v58 = vpop.f32.mrf.mxu0 }
 0x1b0   :  { %1353 = vmatmul.mubr.msk.bf16.vlgmr.msra.gmra.mxu1 %vm112_vm3, %v1520_v7 }
 0x1b1   :  { %1363 = vmatpush3.bf16.msra.mxu1 %v507_v59  ;;  %1364 = vmatprep.mubr.msk.bf16.mxu1 %vm1461_vm2, %v1459_v0 }
 0x1b2   :  { %1374 = vmatprep.subr.bf16.mxu1 %v1459_v0 }
 0x1b8   :  { %1365 = vmatmul.mubr.msk.bf16.vlgmr.msra.gmra.mxu1 %vm59_vm4, %v1536_v13 }
 0x1b9   :  { %1376 = vmatprep.mubr.msk.bf16.mxu1 %vm1461_vm2, %v1459_v0 }
 0x268   :  { %v351_v3 = vpop.f32.mrf.mxu1 }
 0x269   :  { %v352_v4 = vadd.f32 %v351_v3, %v1625_v60 }
 0x26a   :  { %v1342_v5 = vpop.f32.mrf.mxu1 }
 0x26b   :  { %v358_v10 = vmax.f32 %v352_v4, 0.0  ;;  %v791_v4 = vand.u32 %v1245_v2, %v1513_v6 }
 0x26c   :  { %v354_v12 = vpop.f32.mrf.mxu1 }
 0x26d   :  { %v360_v14 = vmax.f32 %v218_v8, %v358_v10  ;;  %v355_v15 = vadd.f32 %v354_v12, %v1628_v62 }
 0x26e   :  { %v1343_v16 = vpop.f32.mrf.mxu1 }
 0x26f   :  { %v359_v20 = vmax.f32 %v355_v15, 0.0 }
 0x270   :  { %v447_v21 = vpop.f32.mrf.mxu1 }
 0x271   :  { %v361_v22 = vmax.f32 %v219_v18, %v359_v20  ;;  %v453_v23 = vadd.f32 %v447_v21, %v407_v19 }
 0x272   :  { %v1354_v24 = vpop.f32.mrf.mxu1 }
 0x273   :  { %v454_v25 = vmax.f32 %v453_v23, 0.0 }
 0x274   :  { %v450_v26 = vpop.f32.mrf.mxu1 }
 0x275   :  { %v455_v27 = vpack.c.bf16 %v454_v25, %v454_v25 }
 0x276   :  { %v1355_v28 = vpop.f32.mrf.mxu1 }
 0x277   :  { %v457_v30 = vsel %vm171_vm6, %v455_v27, 0  ;;  %v1247_v27 = vld [vmem:[%s1776_s1 + $0xa] sm:$0x3] }
 0x278   :  { %1357 = vmatpush3.bf16.msra.mxu0 %v457_v30  ;;  %v543_v31 = vpop.f32.mrf.mxu1  ;;  %v837_v30 = vsel %vm64_vm0, %v1247_v27, 0 }
 0x279   :  { %1368 = vmatprep.subr.bf16.mxu0 %v1459_v0  ;;  %v549_v47 = vadd.f32 %v543_v31, %v1568_v17 }
 0x27a   :  { %v1366_v34 = vpop.f32.mrf.mxu1 }
 0x27b   :  { %1359 = vmatmul.mubr.msk.bf16.vlgmr.msra.gmra.mxu0 %vm167_vm7, %v1578_v33  ;;  %v1250_v34 = vld [vmem:[%s1777_s0 + $0xc] sm:$0x3] }
 0x27c   :  { %1369 = vmatpush3.bf16.msra.mxu0 %v553_v32  ;;  %1370 = vmatprep.mubr.msk.bf16.mxu0 %vm1461_vm2, %v1459_v0  ;;  %v546_v35 = vpop.f32.mrf.mxu1  ;;  %v933_v36 = vand.u32 %v1250_v34, %v1513_v6 }
 0x27d   :  { %1380 = vmatprep.subr.bf16.mxu0 %v1459_v0 }
 0x27e   :  { %v1367_v37 = vpop.f32.mrf.mxu1 }
 0x283   :  { %1371 = vmatmul.mubr.msk.bf16.vlgmr.msra.gmra.mxu0 %vm112_vm3, %v1520_v7 }
 0x284   :  { %1381 = vmatpush3.bf16.msra.mxu0 %v649_v38  ;;  %1382 = vmatprep.mubr.msk.bf16.mxu0 %vm1461_vm2, %v1459_v0 }
 0x285   :  { %1392 = vmatprep.subr.bf16.mxu0 %v1459_v0 }
 0x28b   :  { %1383 = vmatmul.mubr.msk.bf16.vlgmr.msra.gmra.mxu0 %vm59_vm4, %v1536_v13 }
 0x28c   :  { %1394 = vmatprep.mubr.msk.bf16.mxu0 %vm1461_vm2, %v1459_v0 }
 0x33b   :  { %v493_v39 = vpop.f32.mrf.mxu0 }
 0x33c   :  { %v494_v40 = vadd.f32 %v493_v39, %v1625_v60 }
 0x33d   :  { %v1360_v41 = vpop.f32.mrf.mxu0 }
 0x33e   :  { %v500_v42 = vmax.f32 %v494_v40, 0.0 }
 0x33f   :  { %v496_v43 = vpop.f32.mrf.mxu0 }
 0x340   :  { %v502_v44 = vmax.f32 %v360_v14, %v500_v42  ;;  %v497_v45 = vadd.f32 %v496_v43, %v1628_v62 }
 0x341   :  { %v1361_v46 = vpop.f32.mrf.mxu0 }
 0x342   :  { %v501_v48 = vmax.f32 %v497_v45, 0.0 }
 0x343   :  { %v589_v49 = vpop.f32.mrf.mxu0 }
 0x344   :  { %v503_v50 = vmax.f32 %v361_v22, %v501_v48  ;;  %v595_v51 = vadd.f32 %v589_v49, %v549_v47 }
 0x345   :  { %v1372_v52 = vpop.f32.mrf.mxu0 }
 0x346   :  { %v596_v53 = vmax.f32 %v595_v51, 0.0 }
 0x347   :  { %v592_v54 = vpop.f32.mrf.mxu0 }
 0x348   :  { %v597_v55 = vpack.c.bf16 %v596_v53, %v596_v53 }
 0x349   :  { %v1373_v56 = vpop.f32.mrf.mxu0 }
 0x34a   :  { %v599_v58 = vsel %vm171_vm6, %v597_v55, 0  ;;  %v1252_v55 = vld [vmem:[%s1776_s1 + $0xc] sm:$0x3] }
 0x34b   :  { %1375 = vmatpush3.bf16.msra.mxu1 %v599_v58  ;;  %v685_v59 = vpop.f32.mrf.mxu0  ;;  %v979_v58 = vsel %vm64_vm0, %v1252_v55, 0 }
 0x34c   :  { %1386 = vmatprep.subr.bf16.mxu1 %v1459_v0  ;;  %v691_v16 = vadd.f32 %v685_v59, %v1568_v17 }
 0x34d   :  { %v1384_v63 = vpop.f32.mrf.mxu0 }
 0x34e   :  { %1377 = vmatmul.mubr.msk.bf16.vlgmr.msra.gmra.mxu1 %vm167_vm7, %v1578_v33  ;;  %v1255_v63 = vld [vmem:[%s1777_s0 + $0xe] sm:$0x3] }
 0x34f   :  { %1387 = vmatpush3.bf16.msra.mxu1 %v695_v61  ;;  %1388 = vmatprep.mubr.msk.bf16.mxu1 %vm1461_vm2, %v1459_v0  ;;  %v688_v1 = vpop.f32.mrf.mxu0  ;;  %v1075_v2 = vand.u32 %v1255_v63, %v1513_v6 }
 0x350   :  { %1398 = vmatprep.subr.bf16.mxu1 %v1459_v0 }
 0x351   :  { %v1385_v3 = vpop.f32.mrf.mxu0 }
 0x356   :  { %1389 = vmatmul.mubr.msk.bf16.vlgmr.msra.gmra.mxu1 %vm112_vm3, %v1520_v7 }
 0x357   :  { %1399 = vmatpush3.bf16.msra.mxu1 %v791_v4  ;;  %1400 = vmatprep.mubr.msk.bf16.mxu1 %vm1461_vm2, %v1459_v0 }
 0x358   :  { %1410 = vmatprep.subr.bf16.mxu1 %v1459_v0 }
 0x35e   :  { %1401 = vmatmul.mubr.msk.bf16.vlgmr.msra.gmra.mxu1 %vm59_vm4, %v1536_v13 }
 0x35f   :  { %1412 = vmatprep.mubr.msk.bf16.mxu1 %vm1461_vm2, %v1459_v0 }
 0x40e   :  { %v635_v5 = vpop.f32.mrf.mxu1 }
 0x40f   :  { %v636_v8 = vadd.f32 %v635_v5, %v1625_v60 }
 0x410   :  { %v1378_v9 = vpop.f32.mrf.mxu1 }
 0x411   :  { %v642_v10 = vmax.f32 %v636_v8, 0.0 }
 0x412   :  { %v638_v11 = vpop.f32.mrf.mxu1 }
 0x413   :  { %v644_v12 = vmax.f32 %v502_v44, %v642_v10  ;;  %v639_v14 = vadd.f32 %v638_v11, %v1628_v62 }
 0x414   :  { %v1379_v15 = vpop.f32.mrf.mxu1 }
 0x415   :  { %v643_v18 = vmax.f32 %v639_v14, 0.0 }
 0x416   :  { %v731_v19 = vpop.f32.mrf.mxu1 }
 0x417   :  { %v645_v20 = vmax.f32 %v503_v50, %v643_v18  ;;  %v737_v21 = vadd.f32 %v731_v19, %v691_v16 }
 0x418   :  { %v1390_v22 = vpop.f32.mrf.mxu1 }
 0x419   :  { %v738_v23 = vmax.f32 %v737_v21, 0.0 }
 0x41a   :  { %v734_v24 = vpop.f32.mrf.mxu1 }
 0x41b   :  { %v739_v25 = vpack.c.bf16 %v738_v23, %v738_v23  ;;  %v1257_v23 = vld [vmem:[%s1776_s1 + $0xe] sm:$0x3] }
 0x41c   :  { %v1391_v26 = vpop.f32.mrf.mxu1 }
 0x41d   :  { %v741_v28 = vsel %vm171_vm6, %v739_v25, 0  ;;  %v1121_v26 = vsel %vm64_vm0, %v1257_v23, 0 }
 0x41e   :  { %1393 = vmatpush3.bf16.msra.mxu0 %v741_v28  ;;  %v827_v29 = vpop.f32.mrf.mxu1 }
 0x41f   :  { %1404 = vmatprep.subr.bf16.mxu0 %v1459_v0  ;;  %v833_v45 = vadd.f32 %v827_v29, %v1568_v17 }
 0x420   :  { %v1402_v31 = vpop.f32.mrf.mxu1 }
 0x421   :  { %1395 = vmatmul.mubr.msk.bf16.vlgmr.msra.gmra.mxu0 %vm167_vm7, %v1578_v33 }
 0x422   :  { %1405 = vmatpush3.bf16.msra.mxu0 %v837_v30  ;;  %1406 = vmatprep.mubr.msk.bf16.mxu0 %vm1461_vm2, %v1459_v0  ;;  %v830_v32 = vpop.f32.mrf.mxu1 }
 0x423   :  { %1416 = vmatprep.subr.bf16.mxu0 %v1459_v0 }
 0x424   :  { %v1403_v35 = vpop.f32.mrf.mxu1 }
 0x429   :  { %1407 = vmatmul.mubr.msk.bf16.vlgmr.msra.gmra.mxu0 %vm112_vm3, %v1520_v7 }
 0x42a   :  { %1417 = vmatpush3.bf16.msra.mxu0 %v933_v36  ;;  %1418 = vmatprep.mubr.msk.bf16.mxu0 %vm1461_vm2, %v1459_v0 }
 0x42b   :  { %1428 = vmatprep.subr.bf16.mxu0 %v1459_v0 }
 0x431   :  { %1419 = vmatmul.mubr.msk.bf16.vlgmr.msra.gmra.mxu0 %vm59_vm4, %v1536_v13 }
 0x432   :  { %1430 = vmatprep.mubr.msk.bf16.mxu0 %vm1461_vm2, %v1459_v0 }
 0x4e1   :  { %v777_v37 = vpop.f32.mrf.mxu0 }
 0x4e2   :  { %v778_v38 = vadd.f32 %v777_v37, %v1625_v60 }
 0x4e3   :  { %v1396_v39 = vpop.f32.mrf.mxu0 }
 0x4e4   :  { %v784_v40 = vmax.f32 %v778_v38, 0.0 }
 0x4e5   :  { %v780_v41 = vpop.f32.mrf.mxu0 }
 0x4e6   :  { %v786_v42 = vmax.f32 %v644_v12, %v784_v40  ;;  %v781_v43 = vadd.f32 %v780_v41, %v1628_v62 }
 0x4e7   :  { %v1397_v44 = vpop.f32.mrf.mxu0 }
 0x4e8   :  { %v785_v46 = vmax.f32 %v781_v43, 0.0 }
 0x4e9   :  { %v873_v47 = vpop.f32.mrf.mxu0 }
 0x4ea   :  { %v787_v48 = vmax.f32 %v645_v20, %v785_v46  ;;  %v879_v49 = vadd.f32 %v873_v47, %v833_v45 }
 0x4eb   :  { %v1408_v50 = vpop.f32.mrf.mxu0 }
 0x4ec   :  { %v880_v51 = vmax.f32 %v879_v49, 0.0 }
 0x4ed   :  { %v876_v52 = vpop.f32.mrf.mxu0 }
 0x4ee   :  { %v881_v53 = vpack.c.bf16 %v880_v51, %v880_v51 }
 0x4ef   :  { %v1409_v54 = vpop.f32.mrf.mxu0 }
 0x4f0   :  { %v883_v56 = vsel %vm171_vm6, %v881_v53, 0 }
 0x4f1   :  { %1411 = vmatpush3.bf16.msra.mxu1 %v883_v56  ;;  %v969_v57 = vpop.f32.mrf.mxu0 }
 0x4f2   :  { %1422 = vmatprep.subr.bf16.mxu1 %v1459_v0  ;;  %v975_v12 = vadd.f32 %v969_v57, %v1568_v17 }
 0x4f3   :  { %v1420_v59 = vpop.f32.mrf.mxu0 }
 0x4f4   :  { %1413 = vmatmul.mubr.msk.bf16.vlgmr.msra.gmra.mxu1 %vm167_vm7, %v1578_v33 }
 0x4f5   :  { %1423 = vmatpush3.bf16.msra.mxu1 %v979_v58  ;;  %1424 = vmatprep.mubr.msk.bf16.mxu1 %vm1461_vm2, %v1459_v0  ;;  %v972_v61 = vpop.f32.mrf.mxu0 }
 0x4f6   :  { %1434 = vmatprep.subr.bf16.mxu1 %v1459_v0 }
 0x4f7   :  { %v1421_v1 = vpop.f32.mrf.mxu0 }
 0x4fc   :  { %1425 = vmatmul.mubr.msk.bf16.vlgmr.msra.gmra.mxu1 %vm112_vm3, %v1520_v7 }
 0x4fd   :  { %1435 = vmatpush3.bf16.msra.mxu1 %v1075_v2  ;;  %1436 = vmatprep.mubr.msk.bf16.mxu1 %vm1461_vm2, %v1459_v0 }
 0x4fe   :  { %1446 = vmatprep.subr.bf16.mxu1 %v1459_v0 }
 0x504   :  { %1437 = vmatmul.mubr.msk.bf16.vlgmr.msra.gmra.mxu1 %vm59_vm4, %v1536_v13 }
 0x505   :  { %1448 = vmatprep.mubr.msk.bf16.mxu1 %vm1461_vm2, %v1459_v0 }
 0x5b4   :  { %v919_v3 = vpop.f32.mrf.mxu1 }
 0x5b5   :  { %v920_v4 = vadd.f32 %v919_v3, %v1625_v60 }
 0x5b6   :  { %v1414_v5 = vpop.f32.mrf.mxu1 }
 0x5b7   :  { %v926_v6 = vmax.f32 %v920_v4, 0.0 }
 0x5b8   :  { %v922_v8 = vpop.f32.mrf.mxu1 }
 0x5b9   :  { %v928_v9 = vmax.f32 %v786_v42, %v926_v6  ;;  %v923_v10 = vadd.f32 %v922_v8, %v1628_v62 }
 0x5ba   :  { %v1415_v11 = vpop.f32.mrf.mxu1 }
 0x5bb   :  { %v927_v14 = vmax.f32 %v923_v10, 0.0 }
 0x5bc   :  { %v1015_v15 = vpop.f32.mrf.mxu1 }
 0x5bd   :  { %v929_v16 = vmax.f32 %v787_v48, %v927_v14  ;;  %v1021_v18 = vadd.f32 %v1015_v15, %v975_v12 }
 0x5be   :  { %v1426_v13 = vpop.f32.mrf.mxu1 }
 0x5bf   :  { %v1022_v19 = vmax.f32 %v1021_v18, 0.0 }
 0x5c0   :  { %v1018_v20 = vpop.f32.mrf.mxu1 }
 0x5c1   :  { %v1023_v21 = vpack.c.bf16 %v1022_v19, %v1022_v19 }
 0x5c2   :  { %v1427_v22 = vpop.f32.mrf.mxu1 }
 0x5c3   :  { %v1025_v24 = vsel %vm171_vm6, %v1023_v21, 0 }
 0x5c4   :  { %1429 = vmatpush3.bf16.msra.mxu0 %v1025_v24  ;;  %v1111_v25 = vpop.f32.mrf.mxu1 }
 0x5c5   :  { %1440 = vmatprep.subr.bf16.mxu0 %v1459_v0  ;;  %v1117_v39 = vadd.f32 %v1111_v25, %v1568_v17 }
 0x5c6   :  { %v1438_v27 = vpop.f32.mrf.mxu1 }
 0x5c7   :  { %1431 = vmatmul.mubr.msk.bf16.vlgmr.msra.gmra.mxu0 %vm167_vm7, %v1578_v33 }
 0x5c8   :  { %1441 = vmatpush3.bf16.msra.mxu0 %v1121_v26  ;;  %1442 = vmatprep.mubr.msk.bf16.mxu0 %vm1461_vm2, %v1459_v0  ;;  %v1114_v28 = vpop.f32.mrf.mxu1 }
 0x5ca   :  { %v1439_v29 = vpop.f32.mrf.mxu1 }
 0x5cf   :  { %1443 = vmatmul.mubr.msk.bf16.vlgmr.msra.gmra.mxu0 %vm112_vm3, %v1520_v7 }
 0x687   :  { %v1061_v30 = vpop.f32.mrf.mxu0 }
 0x688   :  { %v1062_v31 = vadd.f32 %v1061_v30, %v1625_v60 }
 0x689   :  { %v1432_v32 = vpop.f32.mrf.mxu0 }
 0x68a   :  { %v1068_v34 = vmax.f32 %v1062_v31, 0.0 }
 0x68b   :  { %v1064_v35 = vpop.f32.mrf.mxu0 }
 0x68c   :  { %v1070_v36 = vmax.f32 %v928_v9, %v1068_v34  ;;  %v1065_v37 = vadd.f32 %v1064_v35, %v1628_v62 }
 0x68d   :  { %v1433_v38 = vpop.f32.mrf.mxu0 }
 0x68e   :  { %v1069_v40 = vmax.f32 %v1065_v37, 0.0 }
 0x68f   :  { %v1157_v41 = vpop.f32.mrf.mxu0 }
 0x690   :  { %v1071_v0 = vmax.f32 %v929_v16, %v1069_v40  ;;  %v1163_v42 = vadd.f32 %v1157_v41, %v1117_v39 }
 0x691   :  { %v1444_v43 = vpop.f32.mrf.mxu0 }
 0x692   :  { %v1164_v44 = vmax.f32 %v1163_v42, 0.0 }
 0x693   :  { %v1160_v45 = vpop.f32.mrf.mxu0 }
 0x694   :  { %v1165_v7 = vpack.c.bf16 %v1164_v44, %v1164_v44 }
 0x695   :  { %v1445_v46 = vpop.f32.mrf.mxu0 }
 0x696   :  { %v1167_v47 = vsel %vm171_vm6, %v1165_v7, 0 }
 0x697   :  { %1447 = vmatpush3.bf16.msra.mxu1 %v1167_v47 }
 0x69a   :  { %1449 = vmatmul.mubr.msk.bf16.vlgmr.msra.gmra.mxu1 %vm167_vm7, %v1578_v33 }
 0x75a   :  { %v1203_v48 = vpop.f32.mrf.mxu1 }
 0x75b   :  { %v1204_v49 = vadd.f32 %v1203_v48, %v1625_v60 }
 0x75c   :  { %v1450_v50 = vpop.f32.mrf.mxu1 }
 0x75d   :  { %v1210_v17 = vmax.f32 %v1204_v49, 0.0 }
 0x75e   :  { %v1206_v51 = vpop.f32.mrf.mxu1 }
 0x75f   :  { %v1212_v52 = vmax.f32 %v1070_v36, %v1210_v17  ;;  %v1207_v53 = vadd.f32 %v1206_v51, %v1628_v62 }
 0x760   :  { %v1451_v54 = vpop.f32.mrf.mxu1 }
 0x761   :  { %1215 = vst.msk [vmem:[%s1783_s7] sm:$0xff] %vm31_vm5, %v1212_v52  ;;  %v1211_v55 = vmax.f32 %v1207_v53, 0.0 }
 0x763   :  { %v1213_v56 = vmax.f32 %v1071_v0, %v1211_v55 }
 0x765   :  { %1216 = vst.msk [vmem:[%s1783_s7 + $0x8] sm:$0xff] %vm31_vm5, %v1213_v56 }

// kernel: a_call__.3
= control target key start
LH: loop header
LB: loop body
LE: loop exit
PB: predicated region body
PF: predicated region fallthrough
CT: control target
= control target key end

     0   :  { %vm31_vm0 = vcmask 261120   ;;  %v1848_v0 = vmov 0   ;;  %v1849_v3 = vmov 0.0   ;;  %s2254_s6 = inlined_call_operand.vmem [shape: f32[32,1], index: 6, kind: input, shape index: {}]   ;;  %s2255_s4 = inlined_call_operand.vmem [shape: f32[8,1], index: 4, kind: input, shape index: {}]   ;;  %s2256_s7 = inlined_call_operand.vmem [shape: f32[32,32], index: 7, kind: output, shape index: {}]   ;;  %s2257_s2 = inlined_call_operand.vmem [shape: bf16[8,3], index: 2, kind: input, shape index: {}]   ;;  %s2258_s3 = inlined_call_operand.vmem [shape: bf16[8,4], index: 3, kind: input, shape index: {}]   ;;  %s2259_s5 = inlined_call_operand.vmem [shape: bf16[32,8], index: 5, kind: input, shape index: {}]   ;;  %s2260_s0 = inlined_call_operand.vmem [shape: bf16[16,3,32], index: 0, kind: input, shape index: {}]   ;;  %s2261_s1 = inlined_call_operand.vmem [shape: bf16[16,4,32], index: 1, kind: input, shape index: {}]  }
   0x1   :  { %1807 = vset.pattern.permute.xlu1 %v1848_v0  ;;  %1806 = vset.pattern.permute.xlu0 %v1848_v0  ;;  %v49_v1 = vld [vmem:[%s2254_s6 + $0x8] sm:$0xff]  ;;  %v38_v2 = vld [vmem:[%s2255_s4] sm:$0xff]  ;;  %32 = vst.msk [vmem:[%s2256_s7] sm:$0xff] %vm31_vm0, %v1849_v3  ;;  %33 = vst.msk [vmem:[%s2256_s7 + $0x8] sm:$0xff] %vm31_vm0, %v1849_v3 }
   0x2   :  { %34 = vst.msk [vmem:[%s2256_s7 + $0x10] sm:$0xff] %vm31_vm0, %v1849_v3  ;;  %35 = vst.msk [vmem:[%s2256_s7 + $0x18] sm:$0xff] %vm31_vm0, %v1849_v3  ;;  %59 = vperm.xlu1 %1807, %v49_v1   ;;  %41 = vperm.xlu0 %1806, %v38_v2   ;;  %v50_v4 = vld [vmem:[%s2254_s6 + $0x10] sm:$0xff]  ;;  %v48_v5 = vld [vmem:[%s2254_s6] sm:$0xff] }
   0x3   :  { %v1924_v6 = vld [vmem:[%s2257_s2] sm:$0xf]  ;;  %v1939_v9 = vld [vmem:[%s2259_s5 + $0x4] sm:$0xf]  ;;  %v1944_v10 = vld [vmem:[%s2259_s5 + $0x8] sm:$0xf] }
   0x4   :  { %v1929_v7 = vld [vmem:[%s2258_s3] sm:$0xf]  ;;  %v1949_v11 = vld [vmem:[%s2259_s5 + $0xc] sm:$0xf]  ;;  %v51_v12 = vld [vmem:[%s2254_s6 + $0x18] sm:$0xff] }
   0x5   :  { %v1934_v8 = vld [vmem:[%s2259_s5] sm:$0xf]  ;;  %s1984_s5 = smov 0  }
   0x6   :  { %64 = vperm.xlu1 %1807, %v50_v4   ;;  %54 = vperm.xlu0 %1806, %v48_v5  }
   0x8   :  { %v72_v13 = vld [vmem:[%s2256_s7] sm:$0xff]   ;;  %v73_v14 = vld [vmem:[%s2256_s7 + $0x8] sm:$0xff]  }
   0x9   :  { %v74_v15 = vld [vmem:[%s2256_s7 + $0x10] sm:$0xff]   ;;  %v75_v16 = vld [vmem:[%s2256_s7 + $0x18] sm:$0xff]  }
   0xa   :  { %69 = vperm.xlu0 %1806, %v51_v12  }
  0x7d   :  { %v1966_v17 = vpop.permute.xlu1 %59  ;;  %v1968_v18 = vpop.permute.xlu0 %41 }
  0x81   :  { %v1970_v19 = vpop.permute.xlu1 %64  ;;  %v1972_v20 = vpop.permute.xlu0 %54 }
  0x85   :  { %v1974_v21 = vpop.permute.xlu0 %69 }
  0x86 LB: > { %vm95_vm1 = vcmask 1041408   ;;  %vm94_vm2 = vcmask 1040384   ;;  %v1850_v22 = vmov 0.0   ;;  %v1851_v23 = vmov 65535   ;;  %s1537_s6 = sshll.u32 %s1846_s5, 4  ;;  %s81_s5 = sadd.s32 1, %s1846_s5   ;;  %s1846_s5 = sphi %s1984_s5, %s81_s5   ;;  %v1842_v13 = vphi %v72_v13, %v2265_v13   ;;  %v1838_v14 = vphi %v73_v14, %v2264_v14   ;;  %v1834_v15 = vphi %v74_v15, %v2263_v15   ;;  %v1830_v16 = vphi %v75_v16, %v2262_v16  }
  0x87   : > { %1615 = vmatprep.subr.bf16.mxu1 %v1850_v22  ;;  %1609 = vmatprep.subr.bf16.mxu0 %v1850_v22  ;;  %v96_v24 = vsel %vm94_vm2, 4294967295, %v1851_v23  ;;  %vm1852_vm3 = vmmov 0   ;;  %s2014_s14 = scalar_lea.vmem %s2261_s1, %s1537_s6  ;;  %s2019_s17 = scalar_lea.vmem %s2260_s0, %s1537_s6  ;;  %vm145_vm4 = vcmask 31744   ;;  %vm90_vm5 = vcmask 23552  }
  0x88   : > { %v2005_v25 = vsel %vm95_vm1, %v96_v24, 0  ;;  %1617 = vmatprep.mubr.msk.bf16.mxu1 %vm1852_vm3, %v1850_v22  ;;  %1611 = vmatprep.mubr.msk.bf16.mxu0 %vm1852_vm3, %v1850_v22  ;;  %v144_v26 = vld [vmem:[%s2014_s14] sm:$0x3]  ;;  %v1469_v30 = vld [vmem:[%s2019_s17 + $0x2] sm:$0x3]  ;;  %v2036_v32 = vcombine.low %v1934_v8, %v1939_v9  ;;  %vm205_vm6 = vcmask 64512   ;;  %v2050_v47 = vcombine.low %v1944_v10, %v1949_v11 }
  0x89   : > { %v89_v27 = vld [vmem:[%s2019_s17] sm:$0x3]  ;;  %v150_v28 = vsel %vm95_vm1, %v144_v26, 0  ;;  %v278_v31 = vand.u32 %v1469_v30, %v2005_v25  ;;  %vm212_vm7 = vcmask 1043456   ;;  %v1473_v45 = vld [vmem:[%s2014_s14 + $0x2] sm:$0x3] }
  0x8a   : > { %v99_v29 = vand.u32 %v2005_v25, %v89_v27  ;;  %1616 = vmatpush3.bf16.msra.mxu1 %v150_v28  ;;  %v325_v48 = vsel %vm95_vm1, %v1473_v45, 0  ;;  %v1479_v53 = vld [vmem:[%s2019_s17 + $0x4] sm:$0x3]  ;;  %v1489_v27 = vld [vmem:[%s2019_s17 + $0x6] sm:$0x3]  ;;  %p78_p0 = scmp.ge.s32.totalorder %s81_s5, 2  }
  0x8b   : > { %1627 = vmatprep.subr.bf16.mxu1 %v1850_v22  ;;  %v435_v54 = vand.u32 %v1479_v53, %v2005_v25  ;;  %v1483_v3 = vld [vmem:[%s2014_s14 + $0x4] sm:$0x3]  ;;  %v592_v28 = vand.u32 %v1489_v27, %v2005_v25 }
  0x8c   : > { %1610 = vmatpush3.bf16.msra.mxu0 %v99_v29  ;;  %v482_v5 = vsel %vm95_vm1, %v1483_v3, 0 }
  0x8d   : > { %1618 = vmatmul.mubr.msk.bf16.vlgmr.msra.gmra.mxu1 %vm145_vm4, %v1929_v7 }
  0x8e   : > { %1629 = vmatprep.mubr.msk.bf16.mxu1 %vm1852_vm3, %v1850_v22  ;;  %1628 = vmatpush3.bf16.msra.mxu1 %v278_v31 }
  0x8f   : > { %1612 = vmatmul.mubr.msk.bf16.vlgmr.msra.gmra.mxu0 %vm90_vm5, %v1924_v6 }
  0x90   : > { %1623 = vmatprep.mubr.msk.bf16.mxu0 %vm205_vm6, %v2036_v32 }
  0x95   : > { %1630 = vmatmul.mubr.msk.bf16.vlgmr.msra.gmra.mxu1 %vm90_vm5, %v1924_v6 }
  0x96   : > { %1641 = vmatprep.mubr.msk.bf16.mxu1 %vm205_vm6, %v2036_v32 }
 0x14d   : > { %v186_v33 = vpop.f32.mrf.mxu1 }
 0x14f   : > { %v135_v34 = vpop.f32.mrf.mxu0  ;;  %v1619_v36 = vpop.f32.mrf.mxu1 }
 0x150   : > { %v141_v35 = vadd.f32 %v135_v34, %v1968_v18 }
 0x151   : > { %v1613_v37 = vpop.f32.mrf.mxu0  ;;  %v189_v39 = vpop.f32.mrf.mxu1 }
 0x152   : > { %v192_v38 = vadd.f32 %v186_v33, %v141_v35 }
 0x153   : > { %v138_v40 = vpop.f32.mrf.mxu0  ;;  %v1620_v42 = vpop.f32.mrf.mxu1 }
 0x154   : > { %v193_v41 = vmax.f32 %v192_v38, 0.0 }
 0x155   : > { %v1614_v43 = vpop.f32.mrf.mxu0  ;;  %v314_v49 = vpop.f32.mrf.mxu1 }
 0x156   : > { %v194_v44 = vpack.c.bf16 %v193_v41, %v193_v41  ;;  %v320_v58 = vadd.f32 %v314_v49, %v1968_v18 }
 0x157   : > { %v1631_v50 = vpop.f32.mrf.mxu1 }
 0x158   : > { %1753 = vmatprep.subr.msk.bf16.mxu0 %vm212_vm7, %v194_v44  ;;  %v214_v46 = vsel %vm212_vm7, %v194_v44, 0 }
 0x159   : > { %1622 = vmatpush3.bf16.msra.mxu0 %v214_v46  ;;  %v317_v51 = vpop.f32.mrf.mxu1 }
 0x15a   : > { %1633 = vmatprep.subr.bf16.mxu0 %v1850_v22 }
 0x15b   : > { %v1632_v52 = vpop.f32.mrf.mxu1 }
 0x15c   : > { %1624 = vmatmul.mubr.msk.bf16.vlgmr.msra.gmra.mxu0 %vm205_vm6, %v2050_v47 }
 0x15d   : > { %1634 = vmatpush3.bf16.msra.mxu0 %v325_v48  ;;  %1635 = vmatprep.mubr.msk.bf16.mxu0 %vm1852_vm3, %v1850_v22 }
 0x15e   : > { %1645 = vmatprep.subr.bf16.mxu0 %v1850_v22 }
 0x164   : > { %1636 = vmatmul.mubr.msk.bf16.vlgmr.msra.gmra.mxu0 %vm145_vm4, %v1929_v7 }
 0x165   : > { %1647 = vmatprep.mubr.msk.bf16.mxu0 %vm1852_vm3, %v1850_v22  ;;  %1646 = vmatpush3.bf16.msra.mxu0 %v435_v54 }
 0x16c   : > { %1648 = vmatmul.mubr.msk.bf16.vlgmr.msra.gmra.mxu0 %vm90_vm5, %v1924_v6 }
 0x16d   : > { %1659 = vmatprep.mubr.msk.bf16.mxu0 %vm205_vm6, %v2036_v32 }
 0x21c   : > { %v1625_v55 = vpop.f32.mrf.mxu0 }
 0x21d   : > { %v259_v29 = vadd.f32 %v1625_v55, %v1970_v19 }
 0x21e   : > { %v250_v56 = vpop.f32.mrf.mxu0 }
 0x21f   : > { %v251_v30 = vadd.f32 %v250_v56, %v1972_v20  ;;  %v267_v31 = vmax.f32 %v259_v29, 0.0 }
 0x220   : > { %v1626_v57 = vpop.f32.mrf.mxu0 }
 0x221   : > { %v262_v33 = vadd.f32 %v1626_v57, %v1974_v21  ;;  %v265_v34 = vmax.f32 %v251_v30, 0.0  ;;  %v271_v39 = vmax.f32 %v1834_v15, %v267_v31 }
 0x222   : > { %v253_v59 = vpop.f32.mrf.mxu0 }
 0x223   : > { %v254_v35 = vadd.f32 %v253_v59, %v1966_v17  ;;  %v268_v40 = vmax.f32 %v262_v33, 0.0  ;;  %v269_v43 = vmax.f32 %v1842_v13, %v265_v34 }
 0x224   : > { %v361_v60 = vpop.f32.mrf.mxu0 }
 0x225   : > { %v367_v61 = vadd.f32 %v361_v60, %v320_v58  ;;  %v266_v44 = vmax.f32 %v254_v35, 0.0  ;;  %v272_v52 = vmax.f32 %v1830_v16, %v268_v40 }
 0x226   : > { %v1637_v62 = vpop.f32.mrf.mxu0 }
 0x227   : > { %v368_v63 = vmax.f32 %v367_v61, 0.0  ;;  %v270_v56 = vmax.f32 %v1838_v14, %v266_v44 }
 0x228   : > { %v364_v0 = vpop.f32.mrf.mxu0 }
 0x229   : > { %v369_v1 = vpack.c.bf16 %v368_v63, %v368_v63 }
 0x22a   : > { %v1638_v2 = vpop.f32.mrf.mxu0 }
 0x22b   : > { %1754 = vmatprep.subr.msk.bf16.mxu1 %vm212_vm7, %v369_v1  ;;  %v371_v4 = vsel %vm212_vm7, %v369_v1, 0  ;;  %v1493_v1 = vld [vmem:[%s2014_s14 + $0x6] sm:$0x3] }
 0x22c   : > { %1640 = vmatpush3.bf16.msra.mxu1 %v371_v4  ;;  %v471_v12 = vpop.f32.mrf.mxu0  ;;  %v639_v14 = vsel %vm95_vm1, %v1493_v1, 0 }
 0x22d   : > { %1651 = vmatprep.subr.bf16.mxu1 %v1850_v22  ;;  %v477_v48 = vadd.f32 %v471_v12, %v1968_v18  ;;  %v1499_v12 = vld [vmem:[%s2019_s17 + $0x8] sm:$0x3] }
 0x22e   : > { %v1649_v23 = vpop.f32.mrf.mxu0 }
 0x22f   : > { %1642 = vmatmul.mubr.msk.bf16.vlgmr.msra.gmra.mxu1 %vm205_vm6, %v2050_v47  ;;  %v749_v23 = vand.u32 %v1499_v12, %v2005_v25 }
 0x230   : > { %1652 = vmatpush3.bf16.msra.mxu1 %v482_v5  ;;  %1653 = vmatprep.mubr.msk.bf16.mxu1 %vm1852_vm3, %v1850_v22  ;;  %v474_v24 = vpop.f32.mrf.mxu0 }
 0x231   : > { %1663 = vmatprep.subr.bf16.mxu1 %v1850_v22 }
 0x232   : > { %v1650_v26 = vpop.f32.mrf.mxu0 }
 0x237   : > { %1654 = vmatmul.mubr.msk.bf16.vlgmr.msra.gmra.mxu1 %vm145_vm4, %v1929_v7 }
 0x238   : > { %1665 = vmatprep.mubr.msk.bf16.mxu1 %vm1852_vm3, %v1850_v22  ;;  %1664 = vmatpush3.bf16.msra.mxu1 %v592_v28 }
 0x23f   : > { %1666 = vmatmul.mubr.msk.bf16.vlgmr.msra.gmra.mxu1 %vm90_vm5, %v1924_v6 }
 0x240   : > { %1677 = vmatprep.mubr.msk.bf16.mxu1 %vm205_vm6, %v2036_v32 }
 0x2ef   : > { %v1643_v36 = vpop.f32.mrf.mxu1 }
 0x2f0   : > { %v416_v37 = vadd.f32 %v1643_v36, %v1970_v19 }
 0x2f1   : > { %v407_v38 = vpop.f32.mrf.mxu1 }
 0x2f2   : > { %v424_v41 = vmax.f32 %v416_v37, 0.0  ;;  %v408_v42 = vadd.f32 %v407_v38, %v1972_v20 }
 0x2f3   : > { %v1644_v45 = vpop.f32.mrf.mxu1 }
 0x2f4   : > { %v428_v46 = vmax.f32 %v271_v39, %v424_v41  ;;  %v422_v49 = vmax.f32 %v408_v42, 0.0  ;;  %v419_v50 = vadd.f32 %v1644_v45, %v1974_v21 }
 0x2f5   : > { %v410_v51 = vpop.f32.mrf.mxu1 }
 0x2f6   : > { %v426_v53 = vmax.f32 %v269_v43, %v422_v49  ;;  %v425_v15 = vmax.f32 %v419_v50, 0.0  ;;  %v411_v54 = vadd.f32 %v410_v51, %v1966_v17  ;;  %v1503_v51 = vld [vmem:[%s2014_s14 + $0x8] sm:$0x3] }
 0x2f7   : > { %v518_v55 = vpop.f32.mrf.mxu1 }
 0x2f8   : > { %v429_v13 = vmax.f32 %v272_v52, %v425_v15  ;;  %v423_v57 = vmax.f32 %v411_v54, 0.0  ;;  %v524_v58 = vadd.f32 %v518_v55, %v477_v48 }
 0x2f9   : > { %v1655_v59 = vpop.f32.mrf.mxu1 }
 0x2fa   : > { %v427_v60 = vmax.f32 %v270_v56, %v423_v57  ;;  %v525_v61 = vmax.f32 %v524_v58, 0.0 }
 0x2fb   : > { %v521_v62 = vpop.f32.mrf.mxu1 }
 0x2fc   : > { %v526_v63 = vpack.c.bf16 %v525_v61, %v525_v61 }
 0x2fd   : > { %v1656_v0 = vpop.f32.mrf.mxu1 }
 0x2fe   : > { %1755 = vmatprep.subr.msk.bf16.mxu0 %vm212_vm7, %v526_v63  ;;  %v528_v16 = vsel %vm212_vm7, %v526_v63, 0 }
 0x2ff   : > { %1658 = vmatpush3.bf16.msra.mxu0 %v528_v16  ;;  %v628_v2 = vpop.f32.mrf.mxu1 }
 0x300   : > { %1669 = vmatprep.subr.bf16.mxu0 %v1850_v22  ;;  %v634_v33 = vadd.f32 %v628_v2, %v1968_v18 }
 0x301   : > { %v1667_v3 = vpop.f32.mrf.mxu1 }
 0x302   : > { %1660 = vmatmul.mubr.msk.bf16.vlgmr.msra.gmra.mxu0 %vm205_vm6, %v2050_v47 }
 0x303   : > { %1670 = vmatpush3.bf16.msra.mxu0 %v639_v14  ;;  %1671 = vmatprep.mubr.msk.bf16.mxu0 %vm1852_vm3, %v1850_v22  ;;  %v631_v4 = vpop.f32.mrf.mxu1 }
 0x304   : > { %1681 = vmatprep.subr.bf16.mxu0 %v1850_v22 }
 0x305   : > { %v1668_v5 = vpop.f32.mrf.mxu1 }
 0x30a   : > { %1672 = vmatmul.mubr.msk.bf16.vlgmr.msra.gmra.mxu0 %vm145_vm4, %v1929_v7 }
 0x30b   : > { %1683 = vmatprep.mubr.msk.bf16.mxu0 %vm1852_vm3, %v1850_v22  ;;  %1682 = vmatpush3.bf16.msra.mxu0 %v749_v23 }
 0x312   : > { %1684 = vmatmul.mubr.msk.bf16.vlgmr.msra.gmra.mxu0 %vm90_vm5, %v1924_v6 }
 0x313   : > { %1695 = vmatprep.mubr.msk.bf16.mxu0 %vm205_vm6, %v2036_v32 }
 0x3c2   : > { %v1661_v24 = vpop.f32.mrf.mxu0 }
 0x3c3   : > { %v573_v26 = vadd.f32 %v1661_v24, %v1970_v19 }
 0x3c4   : > { %v564_v27 = vpop.f32.mrf.mxu0 }
 0x3c5   : > { %v581_v28 = vmax.f32 %v573_v26, 0.0  ;;  %v565_v29 = vadd.f32 %v564_v27, %v1972_v20 }
 0x3c6   : > { %v1662_v30 = vpop.f32.mrf.mxu0 }
 0x3c7   : > { %v585_v31 = vmax.f32 %v428_v46, %v581_v28  ;;  %v579_v34 = vmax.f32 %v565_v29, 0.0  ;;  %v576_v35 = vadd.f32 %v1662_v30, %v1974_v21 }
 0x3c8   : > { %v567_v36 = vpop.f32.mrf.mxu0 }
 0x3c9   : > { %v583_v37 = vmax.f32 %v426_v53, %v579_v34  ;;  %v582_v38 = vmax.f32 %v576_v35, 0.0  ;;  %v568_v39 = vadd.f32 %v567_v36, %v1966_v17  ;;  %v796_v53 = vsel %vm95_vm1, %v1503_v51, 0  ;;  %v1513_v34 = vld [vmem:[%s2014_s14 + $0xa] sm:$0x3] }
 0x3ca   : > { %v675_v40 = vpop.f32.mrf.mxu0  ;;  %v953_v36 = vsel %vm95_vm1, %v1513_v34, 0 }
 0x3cb   : > { %v586_v41 = vmax.f32 %v429_v13, %v582_v38  ;;  %v580_v42 = vmax.f32 %v568_v39, 0.0  ;;  %v681_v43 = vadd.f32 %v675_v40, %v634_v33  ;;  %v1509_v13 = vld [vmem:[%s2019_s17 + $0xa] sm:$0x3] }
 0x3cc   : > { %v1673_v44 = vpop.f32.mrf.mxu0  ;;  %v906_v57 = vand.u32 %v1509_v13, %v2005_v25 }
 0x3cd   : > { %v584_v45 = vmax.f32 %v427_v60, %v580_v42  ;;  %v682_v48 = vmax.f32 %v681_v43, 0.0 }
 0x3ce   : > { %v678_v49 = vpop.f32.mrf.mxu0 }
 0x3cf   : > { %v683_v46 = vpack.c.bf16 %v682_v48, %v682_v48 }
 0x3d0   : > { %v1674_v50 = vpop.f32.mrf.mxu0 }
 0x3d1   : > { %1756 = vmatprep.subr.msk.bf16.mxu1 %vm212_vm7, %v683_v46  ;;  %v685_v52 = vsel %vm212_vm7, %v683_v46, 0 }
 0x3d2   : > { %1676 = vmatpush3.bf16.msra.mxu1 %v685_v52  ;;  %v785_v15 = vpop.f32.mrf.mxu0 }
 0x3d3   : > { %1687 = vmatprep.subr.bf16.mxu1 %v1850_v22  ;;  %v791_v1 = vadd.f32 %v785_v15, %v1968_v18 }
 0x3d4   : > { %v1685_v54 = vpop.f32.mrf.mxu0 }
 0x3d5   : > { %1678 = vmatmul.mubr.msk.bf16.vlgmr.msra.gmra.mxu1 %vm205_vm6, %v2050_v47 }
 0x3d6   : > { %1688 = vmatpush3.bf16.msra.mxu1 %v796_v53  ;;  %1689 = vmatprep.mubr.msk.bf16.mxu1 %vm1852_vm3, %v1850_v22  ;;  %v788_v55 = vpop.f32.mrf.mxu0 }
 0x3d7   : > { %1699 = vmatprep.subr.bf16.mxu1 %v1850_v22 }
 0x3d8   : > { %v1686_v56 = vpop.f32.mrf.mxu0 }
 0x3dd   : > { %1690 = vmatmul.mubr.msk.bf16.vlgmr.msra.gmra.mxu1 %vm145_vm4, %v1929_v7 }
 0x3de   : > { %1701 = vmatprep.mubr.msk.bf16.mxu1 %vm1852_vm3, %v1850_v22  ;;  %1700 = vmatpush3.bf16.msra.mxu1 %v906_v57 }
 0x3e5   : > { %1702 = vmatmul.mubr.msk.bf16.vlgmr.msra.gmra.mxu1 %vm90_vm5, %v1924_v6 }
 0x3e6   : > { %1713 = vmatprep.mubr.msk.bf16.mxu1 %vm205_vm6, %v2036_v32 }
 0x495   : > { %v1679_v58 = vpop.f32.mrf.mxu1 }
 0x496   : > { %v730_v59 = vadd.f32 %v1679_v58, %v1970_v19 }
 0x497   : > { %v721_v60 = vpop.f32.mrf.mxu1 }
 0x498   : > { %v738_v61 = vmax.f32 %v730_v59, 0.0  ;;  %v722_v62 = vadd.f32 %v721_v60, %v1972_v20 }
 0x499   : > { %v1680_v63 = vpop.f32.mrf.mxu1 }
 0x49a   : > { %v742_v0 = vmax.f32 %v585_v31, %v738_v61  ;;  %v736_v16 = vmax.f32 %v722_v62, 0.0  ;;  %v733_v14 = vadd.f32 %v1680_v63, %v1974_v21 }
 0x49b   : > { %v724_v2 = vpop.f32.mrf.mxu1 }
 0x49c   : > { %v740_v3 = vmax.f32 %v583_v37, %v736_v16  ;;  %v739_v4 = vmax.f32 %v733_v14, 0.0  ;;  %v725_v5 = vadd.f32 %v724_v2, %v1966_v17  ;;  %v1523_v16 = vld [vmem:[%s2014_s14 + $0xc] sm:$0x3] }
 0x49d   : > { %v832_v12 = vpop.f32.mrf.mxu1  ;;  %v1110_v2 = vsel %vm95_vm1, %v1523_v16, 0 }
 0x49e   : > { %v743_v23 = vmax.f32 %v586_v41, %v739_v4  ;;  %v737_v24 = vmax.f32 %v725_v5, 0.0  ;;  %v838_v26 = vadd.f32 %v832_v12, %v791_v1  ;;  %v1519_v41 = vld [vmem:[%s2019_s17 + $0xc] sm:$0x3] }
 0x49f   : > { %v1691_v27 = vpop.f32.mrf.mxu1  ;;  %v1063_v42 = vand.u32 %v1519_v41, %v2005_v25 }
 0x4a0   : > { %v741_v28 = vmax.f32 %v584_v45, %v737_v24  ;;  %v839_v29 = vmax.f32 %v838_v26, 0.0 }
 0x4a1   : > { %v835_v30 = vpop.f32.mrf.mxu1 }
 0x4a2   : > { %v840_v31 = vpack.c.bf16 %v839_v29, %v839_v29 }
 0x4a3   : > { %v1692_v33 = vpop.f32.mrf.mxu1 }
 0x4a4   : > { %1757 = vmatprep.subr.msk.bf16.mxu0 %vm212_vm7, %v840_v31  ;;  %v842_v35 = vsel %vm212_vm7, %v840_v31, 0 }
 0x4a5   : > { %1694 = vmatpush3.bf16.msra.mxu0 %v842_v35  ;;  %v942_v37 = vpop.f32.mrf.mxu1 }
 0x4a6   : > { %1705 = vmatprep.subr.bf16.mxu0 %v1850_v22  ;;  %v948_v51 = vadd.f32 %v942_v37, %v1968_v18 }
 0x4a7   : > { %v1703_v38 = vpop.f32.mrf.mxu1 }
 0x4a8   : > { %1696 = vmatmul.mubr.msk.bf16.vlgmr.msra.gmra.mxu0 %vm205_vm6, %v2050_v47 }
 0x4a9   : > { %1706 = vmatpush3.bf16.msra.mxu0 %v953_v36  ;;  %1707 = vmatprep.mubr.msk.bf16.mxu0 %vm1852_vm3, %v1850_v22  ;;  %v945_v39 = vpop.f32.mrf.mxu1 }
 0x4aa   : > { %1717 = vmatprep.subr.bf16.mxu0 %v1850_v22 }
 0x4ab   : > { %v1704_v40 = vpop.f32.mrf.mxu1 }
 0x4b0   : > { %1708 = vmatmul.mubr.msk.bf16.vlgmr.msra.gmra.mxu0 %vm145_vm4, %v1929_v7 }
 0x4b1   : > { %1719 = vmatprep.mubr.msk.bf16.mxu0 %vm1852_vm3, %v1850_v22  ;;  %1718 = vmatpush3.bf16.msra.mxu0 %v1063_v42 }
 0x4b8   : > { %1720 = vmatmul.mubr.msk.bf16.vlgmr.msra.gmra.mxu0 %vm90_vm5, %v1924_v6 }
 0x4b9   : > { %1731 = vmatprep.mubr.msk.bf16.mxu0 %vm205_vm6, %v2036_v32 }
 0x568   : > { %v1697_v43 = vpop.f32.mrf.mxu0 }
 0x569   : > { %v887_v44 = vadd.f32 %v1697_v43, %v1970_v19 }
 0x56a   : > { %v878_v45 = vpop.f32.mrf.mxu0 }
 0x56b   : > { %v895_v48 = vmax.f32 %v887_v44, 0.0  ;;  %v879_v49 = vadd.f32 %v878_v45, %v1972_v20 }
 0x56c   : > { %v1698_v46 = vpop.f32.mrf.mxu0 }
 0x56d   : > { %v899_v50 = vmax.f32 %v742_v0, %v895_v48  ;;  %v893_v52 = vmax.f32 %v879_v49, 0.0  ;;  %v890_v53 = vadd.f32 %v1698_v46, %v1974_v21 }
 0x56e   : > { %v881_v15 = vpop.f32.mrf.mxu0 }
 0x56f   : > { %v897_v54 = vmax.f32 %v740_v3, %v893_v52  ;;  %v896_v55 = vmax.f32 %v890_v53, 0.0  ;;  %v882_v56 = vadd.f32 %v881_v15, %v1966_v17 }
 0x570   : > { %v989_v13 = vpop.f32.mrf.mxu0 }
 0x571   : > { %v900_v57 = vmax.f32 %v743_v23, %v896_v55  ;;  %v894_v58 = vmax.f32 %v882_v56, 0.0  ;;  %v995_v59 = vadd.f32 %v989_v13, %v948_v51  ;;  %v1529_v23 = vld [vmem:[%s2019_s17 + $0xe] sm:$0x3] }
 0x572   : > { %v1709_v60 = vpop.f32.mrf.mxu0  ;;  %v1220_v24 = vand.u32 %v1529_v23, %v2005_v25 }
 0x573   : > { %v898_v61 = vmax.f32 %v741_v28, %v894_v58  ;;  %v996_v62 = vmax.f32 %v995_v59, 0.0 }
 0x574   : > { %v992_v63 = vpop.f32.mrf.mxu0 }
 0x575   : > { %v997_v0 = vpack.c.bf16 %v996_v62, %v996_v62 }
 0x576   : > { %v1710_v1 = vpop.f32.mrf.mxu0 }
 0x577   : > { %1758 = vmatprep.subr.msk.bf16.mxu1 %vm212_vm7, %v997_v0  ;;  %v999_v14 = vsel %vm212_vm7, %v997_v0, 0 }
 0x578   : > { %1712 = vmatpush3.bf16.msra.mxu1 %v999_v14  ;;  %v1099_v3 = vpop.f32.mrf.mxu0 }
 0x579   : > { %1723 = vmatprep.subr.bf16.mxu1 %v1850_v22  ;;  %v1105_v34 = vadd.f32 %v1099_v3, %v1968_v18 }
 0x57a   : > { %v1721_v4 = vpop.f32.mrf.mxu0 }
 0x57b   : > { %1714 = vmatmul.mubr.msk.bf16.vlgmr.msra.gmra.mxu1 %vm205_vm6, %v2050_v47 }
 0x57c   : > { %1724 = vmatpush3.bf16.msra.mxu1 %v1110_v2  ;;  %1725 = vmatprep.mubr.msk.bf16.mxu1 %vm1852_vm3, %v1850_v22  ;;  %v1102_v5 = vpop.f32.mrf.mxu0 }
 0x57d   : > { %1735 = vmatprep.subr.bf16.mxu1 %v1850_v22 }
 0x57e   : > { %v1722_v12 = vpop.f32.mrf.mxu0 }
 0x583   : > { %1726 = vmatmul.mubr.msk.bf16.vlgmr.msra.gmra.mxu1 %vm145_vm4, %v1929_v7 }
 0x584   : > { %1737 = vmatprep.mubr.msk.bf16.mxu1 %vm1852_vm3, %v1850_v22  ;;  %1736 = vmatpush3.bf16.msra.mxu1 %v1220_v24 }
 0x58b   : > { %1738 = vmatmul.mubr.msk.bf16.vlgmr.msra.gmra.mxu1 %vm90_vm5, %v1924_v6 }
 0x58c   : > { %1749 = vmatprep.mubr.msk.bf16.mxu1 %vm205_vm6, %v2036_v32 }
 0x63b   : > { %v1715_v26 = vpop.f32.mrf.mxu1 }
 0x63c   : > { %v1044_v27 = vadd.f32 %v1715_v26, %v1970_v19 }
 0x63d   : > { %v1035_v28 = vpop.f32.mrf.mxu1 }
 0x63e   : > { %v1052_v29 = vmax.f32 %v1044_v27, 0.0  ;;  %v1036_v30 = vadd.f32 %v1035_v28, %v1972_v20 }
 0x63f   : > { %v1716_v31 = vpop.f32.mrf.mxu1 }
 0x640   : > { %v1056_v33 = vmax.f32 %v899_v50, %v1052_v29  ;;  %v1050_v35 = vmax.f32 %v1036_v30, 0.0  ;;  %v1047_v25 = vadd.f32 %v1716_v31, %v1974_v21  ;;  %v1533_v50 = vld [vmem:[%s2014_s14 + $0xe] sm:$0x3] }
 0x641   : > { %v1038_v36 = vpop.f32.mrf.mxu1  ;;  %v1267_v52 = vsel %vm95_vm1, %v1533_v50, 0 }
 0x642   : > { %v1054_v37 = vmax.f32 %v897_v54, %v1050_v35  ;;  %v1053_v38 = vmax.f32 %v1047_v25, 0.0  ;;  %v1039_v32 = vadd.f32 %v1038_v36, %v1966_v17 }
 0x643   : > { %v1146_v39 = vpop.f32.mrf.mxu1 }
 0x644   : > { %v1057_v40 = vmax.f32 %v900_v57, %v1053_v38  ;;  %v1051_v41 = vmax.f32 %v1039_v32, 0.0  ;;  %v1152_v42 = vadd.f32 %v1146_v39, %v1105_v34 }
 0x645   : > { %v1727_v43 = vpop.f32.mrf.mxu1 }
 0x646   : > { %v1055_v44 = vmax.f32 %v898_v61, %v1051_v41  ;;  %v1153_v45 = vmax.f32 %v1152_v42, 0.0 }
 0x647   : > { %v1149_v48 = vpop.f32.mrf.mxu1 }
 0x648   : > { %v1154_v49 = vpack.c.bf16 %v1153_v45, %v1153_v45 }
 0x649   : > { %v1728_v46 = vpop.f32.mrf.mxu1 }
 0x64a   : > { %1759 = vmatprep.subr.msk.bf16.mxu0 %vm212_vm7, %v1154_v49  ;;  %v1156_v51 = vsel %vm212_vm7, %v1154_v49, 0 }
 0x64b   : > { %1730 = vmatpush3.bf16.msra.mxu0 %v1156_v51  ;;  %v1256_v53 = vpop.f32.mrf.mxu1 }
 0x64c   : > { %1741 = vmatprep.subr.bf16.mxu0 %v1850_v22  ;;  %v1262_v62 = vadd.f32 %v1256_v53, %v1968_v18 }
 0x64d   : > { %v1739_v15 = vpop.f32.mrf.mxu1 }
 0x64e   : > { %1732 = vmatmul.mubr.msk.bf16.vlgmr.msra.gmra.mxu0 %vm205_vm6, %v2050_v47 }
 0x64f   : > { %1742 = vmatpush3.bf16.msra.mxu0 %v1267_v52  ;;  %1743 = vmatprep.mubr.msk.bf16.mxu0 %vm1852_vm3, %v1850_v22  ;;  %v1259_v54 = vpop.f32.mrf.mxu1 }
 0x651   : > { %v1740_v55 = vpop.f32.mrf.mxu1 }
 0x656   : > { %1744 = vmatmul.mubr.msk.bf16.vlgmr.msra.gmra.mxu0 %vm145_vm4, %v1929_v7 }
 0x70e   : > { %v1733_v56 = vpop.f32.mrf.mxu0 }
 0x70f   : > { %v1201_v13 = vadd.f32 %v1733_v56, %v1970_v19 }
 0x710   : > { %v1192_v57 = vpop.f32.mrf.mxu0 }
 0x711   : > { %v1209_v58 = vmax.f32 %v1201_v13, 0.0  ;;  %v1193_v59 = vadd.f32 %v1192_v57, %v1972_v20 }
 0x712   : > { %v1734_v60 = vpop.f32.mrf.mxu0 }
 0x713   : > { %v1213_v61 = vmax.f32 %v1056_v33, %v1209_v58  ;;  %v1207_v63 = vmax.f32 %v1193_v59, 0.0  ;;  %v1204_v22 = vadd.f32 %v1734_v60, %v1974_v21 }
 0x714   : > { %v1195_v0 = vpop.f32.mrf.mxu0 }
 0x715   : > { %v1211_v1 = vmax.f32 %v1054_v37, %v1207_v63  ;;  %v1210_v16 = vmax.f32 %v1204_v22, 0.0  ;;  %v1196_v14 = vadd.f32 %v1195_v0, %v1966_v17 }
 0x716   : > { %v1303_v2 = vpop.f32.mrf.mxu0 }
 0x717   : > { %v1214_v3 = vmax.f32 %v1057_v40, %v1210_v16  ;;  %v1208_v4 = vmax.f32 %v1196_v14, 0.0  ;;  %v1309_v5 = vadd.f32 %v1303_v2, %v1262_v62 }
 0x718   : > { %v1745_v12 = vpop.f32.mrf.mxu0 }
 0x719   : > { %v1212_v23 = vmax.f32 %v1055_v44, %v1208_v4  ;;  %v1310_v24 = vmax.f32 %v1309_v5, 0.0 }
 0x71a   : > { %v1306_v26 = vpop.f32.mrf.mxu0 }
 0x71b   : > { %v1311_v27 = vpack.c.bf16 %v1310_v24, %v1310_v24 }
 0x71c   : > { %v1746_v28 = vpop.f32.mrf.mxu0 }
 0x71d   : > { %1760 = vmatprep.subr.msk.bf16.mxu1 %vm212_vm7, %v1311_v27  ;;  %v1313_v29 = vsel %vm212_vm7, %v1311_v27, 0 }
 0x71e   : > { %1748 = vmatpush3.bf16.msra.mxu1 %v1313_v29 }
 0x721   : > { %1750 = vmatmul.mubr.msk.bf16.vlgmr.msra.gmra.mxu1 %vm205_vm6, %v2050_v47 }
 0x7e1   : > { %v1751_v30 = vpop.f32.mrf.mxu1 }
 0x7e2   : > { %v1358_v31 = vadd.f32 %v1751_v30, %v1970_v19 }
 0x7e3   : > { %v1349_v33 = vpop.f32.mrf.mxu1 }
 0x7e4   : > { %v1366_v34 = vmax.f32 %v1358_v31, 0.0  ;;  %v1350_v35 = vadd.f32 %v1349_v33, %v1972_v20 }
 0x7e5   : > { %v1752_v25 = vpop.f32.mrf.mxu1 }
 0x7e6   : > { %v1370_v36 = vmax.f32 %v1213_v61, %v1366_v34   ;;  %v1364_v37 = vmax.f32 %v1350_v35, 0.0  ;;  %v1361_v38 = vadd.f32 %v1752_v25, %v1974_v21 }
 0x7e7   : > { %v1352_v32 = vpop.f32.mrf.mxu1 }
 0x7e8   : > { %v1368_v39 = vmax.f32 %v1211_v1, %v1364_v37   ;;  %v1367_v40 = vmax.f32 %v1361_v38, 0.0  ;;  %v1353_v41 = vadd.f32 %v1352_v32, %v1966_v17  ;;  %v2263_v15 = vmov %v1370_v36  ;;  %1375 = vst.msk [vmem:[%s2256_s7 + $0x10] sm:$0xff] (%p78_p0), %vm31_vm0, %v1370_v36 }
 0x7ea   : > { %v1371_v42 = vmax.f32 %v1214_v3, %v1367_v40   ;;  %v1365_v43 = vmax.f32 %v1353_v41, 0.0  ;;  %v2265_v13 = vmov %v1368_v39  ;;  %80 = sbr.rel (!%p78_p0) target bundleno = 134 (0x86), region = 75  ;;  %1373 = vst.msk [vmem:[%s2256_s7] sm:$0xff] (%p78_p0), %vm31_vm0, %v1368_v39 }
 0x7ec   : > { %v1369_v47 = vmax.f32 %v1212_v23, %v1365_v43   ;;  %v2262_v16 = vmov %v1371_v42  ;;  %1376 = vst.msk [vmem:[%s2256_s7 + $0x18] sm:$0xff] (%p78_p0), %vm31_vm0, %v1371_v42 }
 0x7ee   : > { %v2264_v14 = vmov %v1369_v47  ;;  %1374 = vst.msk [vmem:[%s2256_s7 + $0x8] sm:$0xff] (%p78_p0), %vm31_vm0, %v1369_v47 }

</bundles_post_ra>
